<compile_context>
chip_gen: v5e
topology: v5e:2x2
jax: 0.10.0
libtpu: 0.0.40
codegen_flags: <defaults>
</compile_context>

<pallas_src>
import jax
import jax.numpy as jnp
from jax import lax
from jax.experimental import pallas as pl
from jax.experimental.pallas import tpu as pltpu


def _round_up(x, m):
    return (x + m - 1) // m * m


def gru_fused_kernel(gi_ref, h0_ref, whh_ref, bhn_ref, wout_ref, bout_ref,
                     out_ref, hN_ref, h_scr, hbuf_scr):
    """One (batch-block, time-chunk) grid step: GRU recurrence + fused head.

    gi   : (TC, BB, 3H) f32  x@W_ih^T + b_ih (+ b_hh folded for r/z), time-major
    h0   : (BB, H)           initial hidden state for this batch block
    whh  : (H, 3H)  bf16     fused recurrent weights, gate cols [r|z|n] (VMEM-resident)
    bhn  : (1, H)   f32      b_hh_n (must stay inside the r*(...) term)
    wout : (H, I)   bf16     output head weights (transposed, VMEM-resident)
    bout : (1, I)   f32      output head bias
    out  : (TC, BB, I)       per-timestep Linear-head outputs (time-major)
    hN   : (BB, H)           final hidden state (written on last time chunk)
    h_scr: (BB, H)  f32      hidden state carried across time chunks
    hbuf : (TC, BB, H) f32   this chunk's hidden states (feeds the fused head)
    """
    c = pl.program_id(1)                          # serial time-chunk axis
    tc, bb, h3 = gi_ref.shape
    H = h3 // 3
    mxu_dtype = whh_ref.dtype

    @pl.when(c == 0)
    def _():
        h_scr[...] = h0_ref[...].astype(jnp.float32)

    # Hoist b_hh_n load + broadcast out of the (unrolled) recurrence loop.
    bhn = jnp.broadcast_to(bhn_ref[...].astype(jnp.float32), (bb, H))

    def step(i, h):
        # Single fused (BB, H) @ (H, 3H) recurrent matmul per timestep.
        gh = jnp.dot(h.astype(mxu_dtype), whh_ref[...],
                     preferred_element_type=jnp.float32)          # (BB, 3H)
        g = gi_ref[i]                                             # (BB, 3H)
        r = jax.nn.sigmoid(g[:, :H] + gh[:, :H])
        z = jax.nn.sigmoid(g[:, H:2 * H] + gh[:, H:2 * H])
        n = jnp.tanh(g[:, 2 * H:] + r * (gh[:, 2 * H:] + bhn))
        h_new = (1.0 - z) * n + z * h
        hbuf_scr[i] = h_new
        return h_new

    h_final = lax.fori_loop(0, tc, step, h_scr[...], unroll=min(tc, 8))
    h_scr[...] = h_final

    # Fused output head: one (TC*BB, H) @ (H, I) matmul for the whole chunk.
    y = jnp.dot(hbuf_scr[...].reshape(tc * bb, H).astype(mxu_dtype),
                wout_ref[...], preferred_element_type=jnp.float32)
    y = y + bout_ref[...].astype(jnp.float32)
    out_ref[...] = y.reshape(tc, bb, -1).astype(out_ref.dtype)

    @pl.when(c == pl.num_programs(1) - 1)
    def _():
        hN_ref[...] = h_final.astype(hN_ref.dtype)


def _pick_time_chunk(T, BB, H, I, max_chunk=64, budget_bytes=24 * 1024 * 1024):
    """Largest divisor of T <= max_chunk whose pipelined VMEM footprint fits."""
    def footprint(tc):
        return (2 * tc * BB * 3 * H * 4       # gi blocks (double-buffered)
                + 2 * tc * BB * I * 4         # output blocks (double-buffered)
                + tc * BB * H * 4)            # chunk hidden scratch
    best = 1
    for tc in range(1, min(T, max_chunk) + 1):
        if T % tc == 0 and footprint(tc) <= budget_bytes:
            best = tc
    return best


def rnn_model_forward(X, state, params):
    """Forward pass matching RNNModel.forward.

    X     : (B, T, I)  batch_first input
    state : (1, B, H)  initial hidden state
    returns (output, state) with output: (B*T, I), state: (1, B, H)
    """
    B, T, I = X.shape
    H = params["whh"].shape[1]                 # whh: (3H, H)

    BB = 8                                     # sublane-aligned batch block
    Bp = _round_up(B, BB)
    NB = Bp // BB
    TC = _pick_time_chunk(T, BB, H, I)
    n_chunks = T // TC

    wih, whh = params["wih"], params["whh"]    # (3H, I), (3H, H)
    bih, bhh = params["bih"], params["bhh"]    # (3H,), (3H,)

    # --- Hoisted input projection for ALL timesteps (one batched matmul). ---
    gi = jnp.einsum("bti,gi->btg", X, wih) + bih            # (B, T, 3H)
    bhh_fold = jnp.concatenate([bhh[:2 * H], jnp.zeros((H,), bhh.dtype)])
    gi = gi + bhh_fold                                      # fold b_hh_r, b_hh_z
    gi = jnp.transpose(gi, (1, 0, 2))                       # (T, B, 3H) time-major
    gi = jnp.pad(gi, ((0, 0), (0, Bp - B), (0, 0)))         # pad batch (sublanes)

    h0 = jnp.pad(state[0], ((0, Bp - B), (0, 0)))           # (Bp, H)

    mxu_dtype = jnp.bfloat16
    wh_all = whh.T.astype(mxu_dtype)                        # (H, 3H), cols [r|z|n]
    b_hn = bhh[2 * H:].reshape(1, H)                        # f32, stays in r*(...)
    wout_t = params["wout"].T.astype(mxu_dtype)             # (H, I)
    bout = params["bout"].reshape(1, I)

    # --- VMEM footprint -> explicit limit (v7x has only 64 MiB physical). ---
    vmem_est = (2 * TC * BB * 3 * H * 4                     # gi blocks
                + 2 * TC * BB * I * 4                       # output blocks
                + 4 * BB * H * 4                            # h0 in / hN out blocks
                + 3 * H * H * 2 + H * I * 2                 # bf16 weights (1 copy)
                + (H + I) * 4                               # biases
                + BB * H * 4 + TC * BB * H * 4)             # scratches
    vmem_limit = min(64 * 1024 * 1024, max(16 * 1024 * 1024, 2 * vmem_est))

    cost = pl.CostEstimate(
        flops=(2 * T * Bp * H * 3 * H            # recurrent matmuls
               + 2 * T * Bp * H * I              # fused output head
               + 12 * T * Bp * H),               # gate elementwise
        transcendentals=3 * T * Bp * H,
        bytes_accessed=(T * Bp * 3 * H * 4       # gi in
                        + T * Bp * I * 4         # head output
                        + 3 * H * H * 2 + H * I * 2
                        + 2 * Bp * H * 4),
    )

    grid_spec = pltpu.PrefetchScalarGridSpec(
        num_scalar_prefetch=0,
        grid=(NB, n_chunks),                     # (parallel batch, serial time)
        in_specs=[
            pl.BlockSpec((TC, BB, 3 * H), lambda b, c: (c, b, 0)),     # gi
            pl.BlockSpec((BB, H), lambda b, c: (b, 0)),                # h0
            pl.BlockSpec(memory_space=pltpu.MemorySpace.VMEM),         # wh_all
            pl.BlockSpec(memory_space=pltpu.MemorySpace.VMEM),         # b_hn
            pl.BlockSpec(memory_space=pltpu.MemorySpace.VMEM),         # wout_t
            pl.BlockSpec(memory_space=pltpu.MemorySpace.VMEM),         # bout
        ],
        out_specs=[
            pl.BlockSpec((TC, BB, I), lambda b, c: (c, b, 0)),         # head out
            pl.BlockSpec((BB, H), lambda b, c: (b, 0)),                # final h
        ],
        scratch_shapes=[
            pltpu.VMEM((BB, H), jnp.float32),        # hidden carried across chunks
            pltpu.VMEM((TC, BB, H), jnp.float32),    # chunk hidden states (head input)
        ],
    )

    out_tm, h_last = pl.pallas_call(
        gru_fused_kernel,
        out_shape=(
            jax.ShapeDtypeStruct((T, Bp, I), X.dtype),
            jax.ShapeDtypeStruct((Bp, H), X.dtype),
        ),
        grid_spec=grid_spec,
        compiler_params=pltpu.CompilerParams(
            dimension_semantics=("parallel", "arbitrary"),
            vmem_limit_bytes=int(vmem_limit)),
        cost_estimate=cost,
    )(gi, h0, wh_all, b_hn, wout_t, bout)

    # Transpose only the small (T, Bp, I) head output back to batch-major.
    output = jnp.transpose(out_tm, (1, 0, 2))[:B].reshape(B * T, I)
    new_state = h_last[:B][None, :, :]                       # (1, B, H)
    return output, new_state


def gru_linear_ref(X, state, params):
    """Pure-JAX f32 reference matching the PyTorch module exactly."""
    B, T, I = X.shape
    H = params["whh"].shape[1]
    wih, whh, bih, bhh = params["wih"], params["whh"], params["bih"], params["bhh"]
    h = state[0]
    ys = []
    for t in range(T):
        x = X[:, t, :]
        gi = x @ wih.T + bih
        gh = h @ whh.T + bhh
        r = jax.nn.sigmoid(gi[:, :H] + gh[:, :H])
        z = jax.nn.sigmoid(gi[:, H:2 * H] + gh[:, H:2 * H])
        n = jnp.tanh(gi[:, 2 * H:] + r * gh[:, 2 * H:])
        h = (1.0 - z) * n + z * h
        ys.append(h)
    Y = jnp.stack(ys, axis=1)                                # (B, T, H)
    out = Y.reshape(-1, H) @ params["wout"].T + params["bout"]
    return out, h[None]


def init_params(key, input_size, num_hiddens):
    """Parameter init mirroring RNNModel.__init__ (all weights ~ N(0, 0.001))."""
    ks = jax.random.split(key, 6)
    H, I = num_hiddens, input_size
    std = 0.001
    return {
        "wih": std * jax.random.normal(ks[0], (3 * H, I), jnp.float32),
        "whh": std * jax.random.normal(ks[1], (3 * H, H), jnp.float32),
        "bih": std * jax.random.normal(ks[2], (3 * H,), jnp.float32),
        "bhh": std * jax.random.normal(ks[3], (3 * H,), jnp.float32),
        "wout": std * jax.random.normal(ks[4], (I, H), jnp.float32),
        "bout": std * jax.random.normal(ks[5], (I,), jnp.float32),
    }


if __name__ == "__main__":
    B, T, I, H = 2, 8, 16, 32

    key = jax.random.PRNGKey(0)
    k_x, k_p = jax.random.split(key)

    X = jax.random.normal(k_x, (B, T, I), jnp.float32)
    state = jnp.zeros((1, B, H), jnp.float32)     # begin_state(batch_size=B)
    params = init_params(k_p, I, H)

    output, new_state = rnn_model_forward(X, state, params)
    jax.block_until_ready((output, new_state))

    assert output.shape == (B * T, I)
    assert new_state.shape == (1, B, H)
    assert bool(jnp.all(jnp.isfinite(output)))
    assert bool(jnp.all(jnp.isfinite(new_state)))

    # Tolerance check vs. pure-JAX f32 reference (bf16 only on MXU operands).
    out_ref, state_ref = gru_linear_ref(X, state, params)
    assert float(jnp.max(jnp.abs(output - out_ref))) < 1e-3
    assert float(jnp.max(jnp.abs(new_state - state_ref))) < 1e-3

    print("KERNEL_OK")
</pallas_src>

<mosaic_0001>
module attributes {stable_mosaic.version = 11 : i64} {
  func.func @gru_fused_kernel(%arg0: i32, %arg1: i32, %arg2: memref<8x8x96xf32, #tpu.memory_space<vmem>>, %arg3: memref<8x32xf32, #tpu.memory_space<vmem>>, %arg4: memref<32x96xbf16, #tpu.memory_space<vmem>>, %arg5: memref<1x32xf32, #tpu.memory_space<vmem>>, %arg6: memref<32x16xbf16, #tpu.memory_space<vmem>>, %arg7: memref<1x16xf32, #tpu.memory_space<vmem>>, %arg8: memref<8x8x16xf32, #tpu.memory_space<vmem>>, %arg9: memref<8x32xf32, #tpu.memory_space<vmem>>, %arg10: memref<8x32xf32, #tpu.memory_space<vmem>>, %arg11: memref<8x8x32xf32, #tpu.memory_space<vmem>>) attributes {dimension_semantics = [#tpu.dimension_semantics<parallel>, #tpu.dimension_semantics<arbitrary>], iteration_bounds = array<i64: 1, 1>, scalar_prefetch = 0 : i64, scratch_operands = 2 : i64, tpu.core_type = #tpu.core_type<tc>, window_params = [{transform_indices = @transform_0, window_bounds = array<i64: 8, 8, 96>}, {transform_indices = @transform_1, window_bounds = array<i64: 8, 32>}, {pipeline_mode = #tpu.pipeline_mode<synchronous>, transform_indices = @transform_2, window_bounds = array<i64: 32, 96>}, {pipeline_mode = #tpu.pipeline_mode<synchronous>, transform_indices = @transform_3, window_bounds = array<i64: 1, 32>}, {pipeline_mode = #tpu.pipeline_mode<synchronous>, transform_indices = @transform_4, window_bounds = array<i64: 32, 16>}, {pipeline_mode = #tpu.pipeline_mode<synchronous>, transform_indices = @transform_5, window_bounds = array<i64: 1, 16>}, {transform_indices = @transform_6, window_bounds = array<i64: 8, 8, 16>}, {transform_indices = @transform_7, window_bounds = array<i64: 8, 32>}]} {
    %c0_i32 = arith.constant 0 : i32
    %0 = arith.cmpi eq, %arg1, %c0_i32 : i32
    %1 = arith.extui %0 : i1 to i32
    %c0_i32_0 = arith.constant 0 : i32
    %2 = arith.cmpi ne, %1, %c0_i32_0 : i32
    scf.if %2 {
      %c0_99 = arith.constant 0 : index
      %c0_100 = arith.constant 0 : index
      %317 = vector.load %arg3[%c0_99, %c0_100] : memref<8x32xf32, #tpu.memory_space<vmem>>, vector<8x32xf32>
      %c0_101 = arith.constant 0 : index
      %c0_102 = arith.constant 0 : index
      %318 = vector.load %arg10[%c0_101, %c0_102] : memref<8x32xf32, #tpu.memory_space<vmem>>, vector<8x32xf32>
      tpu.vector_store %arg10[%c0_101, %c0_102], %317 {strides = array<i32>} : memref<8x32xf32, #tpu.memory_space<vmem>>, vector<8x32xf32>,
    } else {
    }
    %c0 = arith.constant 0 : index
    %c0_1 = arith.constant 0 : index
    %3 = vector.load %arg5[%c0, %c0_1] : memref<1x32xf32, #tpu.memory_space<vmem>>, vector<1x32xf32>
    %4 = vector.shape_cast %3 : vector<1x32xf32> to vector<1x32xf32>
    %5 = vector.broadcast %4 : vector<1x32xf32> to vector<8x32xf32>
    %c0_2 = arith.constant 0 : index
    %c0_3 = arith.constant 0 : index
    %6 = vector.load %arg10[%c0_2, %c0_3] : memref<8x32xf32, #tpu.memory_space<vmem>>, vector<8x32xf32>
    %c0_i32_4 = arith.constant 0 : i32
    %7 = arith.truncf %6 : vector<8x32xf32> to vector<8x32xbf16>
    %c0_5 = arith.constant 0 : index
    %c0_6 = arith.constant 0 : index
    %8 = vector.load %arg4[%c0_5, %c0_6] : memref<32x96xbf16, #tpu.memory_space<vmem>>, vector<32x96xbf16>
    %cst = arith.constant dense<0.000000e+00> : vector<8x96xf32>
    %9 = tpu.matmul %7, %8, %cst {dimension_numbers = #tpu.dot_dimension_numbers<[1], [0], [0], [1], [0, 0, 1, 1], [], []>} : vector<8x32xbf16>, vector<32x96xbf16>, vector<8x96xf32> -> vector<8x96xf32>
    %10 = arith.index_cast %c0_i32_4 : i32 to index
    %c0_7 = arith.constant 0 : index
    %c0_8 = arith.constant 0 : index
    %11 = vector.load %arg2[%10, %c0_7, %c0_8] : memref<8x8x96xf32, #tpu.memory_space<vmem>>, vector<1x8x96xf32>
    %12 = vector.shape_cast %11 : vector<1x8x96xf32> to vector<8x96xf32>
    %13 = vector.extract_strided_slice %12 {offsets = [0, 0], sizes = [8, 32], strides = [1, 1]} : vector<8x96xf32> to vector<8x32xf32>
    %14 = vector.extract_strided_slice %9 {offsets = [0, 0], sizes = [8, 32], strides = [1, 1]} : vector<8x96xf32> to vector<8x32xf32>
    %15 = arith.addf %13, %14 : vector<8x32xf32>
    %16 = arith.negf %15 : vector<8x32xf32>
    %17 = math.exp %16 : vector<8x32xf32>
    %cst_9 = arith.constant 1.000000e+00 : f32
    %18 = vector.broadcast %cst_9 : f32 to vector<8x32xf32>
    %19 = arith.addf %18, %17 : vector<8x32xf32>
    %20 = arith.divf %18, %19 : vector<8x32xf32>
    %21 = vector.extract_strided_slice %12 {offsets = [0, 32], sizes = [8, 32], strides = [1, 1]} : vector<8x96xf32> to vector<8x32xf32>
    %22 = vector.extract_strided_slice %9 {offsets = [0, 32], sizes = [8, 32], strides = [1, 1]} : vector<8x96xf32> to vector<8x32xf32>
    %23 = arith.addf %21, %22 : vector<8x32xf32>
    %24 = arith.negf %23 : vector<8x32xf32>
    %25 = math.exp %24 : vector<8x32xf32>
    %cst_10 = arith.constant 1.000000e+00 : f32
    %26 = vector.broadcast %cst_10 : f32 to vector<8x32xf32>
    %27 = arith.addf %26, %25 : vector<8x32xf32>
    %28 = arith.divf %26, %27 : vector<8x32xf32>
    %29 = vector.extract_strided_slice %12 {offsets = [0, 64], sizes = [8, 32], strides = [1, 1]} : vector<8x96xf32> to vector<8x32xf32>
    %30 = vector.extract_strided_slice %9 {offsets = [0, 64], sizes = [8, 32], strides = [1, 1]} : vector<8x96xf32> to vector<8x32xf32>
    %31 = arith.addf %30, %5 : vector<8x32xf32>
    %32 = arith.mulf %20, %31 : vector<8x32xf32>
    %33 = arith.addf %29, %32 : vector<8x32xf32>
    %34 = math.tanh %33 : vector<8x32xf32>
    %cst_11 = arith.constant 1.000000e+00 : f32
    %35 = vector.broadcast %cst_11 : f32 to vector<8x32xf32>
    %36 = arith.subf %35, %28 : vector<8x32xf32>
    %37 = arith.mulf %36, %34 : vector<8x32xf32>
    %38 = arith.mulf %28, %6 : vector<8x32xf32>
    %39 = arith.addf %37, %38 : vector<8x32xf32>
    %40 = arith.index_cast %c0_i32_4 : i32 to index
    %c0_12 = arith.constant 0 : index
    %c0_13 = arith.constant 0 : index
    %41 = vector.load %arg11[%40, %c0_12, %c0_13] : memref<8x8x32xf32, #tpu.memory_space<vmem>>, vector<1x8x32xf32>
    %42 = vector.shape_cast %41 : vector<1x8x32xf32> to vector<8x32xf32>
    %43 = vector.shape_cast %39 : vector<8x32xf32> to vector<1x8x32xf32>
    tpu.vector_store %arg11[%40, %c0_12, %c0_13], %43 {strides = array<i32>} : memref<8x8x32xf32, #tpu.memory_space<vmem>>, vector<1x8x32xf32>,
    %c1_i32 = arith.constant 1 : i32
    %44 = arith.truncf %39 : vector<8x32xf32> to vector<8x32xbf16>
    %c0_14 = arith.constant 0 : index
    %c0_15 = arith.constant 0 : index
    %45 = vector.load %arg4[%c0_14, %c0_15] : memref<32x96xbf16, #tpu.memory_space<vmem>>, vector<32x96xbf16>
    %cst_16 = arith.constant dense<0.000000e+00> : vector<8x96xf32>
    %46 = tpu.matmul %44, %45, %cst_16 {dimension_numbers = #tpu.dot_dimension_numbers<[1], [0], [0], [1], [0, 0, 1, 1], [], []>} : vector<8x32xbf16>, vector<32x96xbf16>, vector<8x96xf32> -> vector<8x96xf32>
    %47 = arith.index_cast %c1_i32 : i32 to index
    %c0_17 = arith.constant 0 : index
    %c0_18 = arith.constant 0 : index
    %48 = vector.load %arg2[%47, %c0_17, %c0_18] : memref<8x8x96xf32, #tpu.memory_space<vmem>>, vector<1x8x96xf32>
    %49 = vector.shape_cast %48 : vector<1x8x96xf32> to vector<8x96xf32>
    %50 = vector.extract_strided_slice %49 {offsets = [0, 0], sizes = [8, 32], strides = [1, 1]} : vector<8x96xf32> to vector<8x32xf32>
    %51 = vector.extract_strided_slice %46 {offsets = [0, 0], sizes = [8, 32], strides = [1, 1]} : vector<8x96xf32> to vector<8x32xf32>
    %52 = arith.addf %50, %51 : vector<8x32xf32>
    %53 = arith.negf %52 : vector<8x32xf32>
    %54 = math.exp %53 : vector<8x32xf32>
    %cst_19 = arith.constant 1.000000e+00 : f32
    %55 = vector.broadcast %cst_19 : f32 to vector<8x32xf32>
    %56 = arith.addf %55, %54 : vector<8x32xf32>
    %57 = arith.divf %55, %56 : vector<8x32xf32>
    %58 = vector.extract_strided_slice %49 {offsets = [0, 32], sizes = [8, 32], strides = [1, 1]} : vector<8x96xf32> to vector<8x32xf32>
    %59 = vector.extract_strided_slice %46 {offsets = [0, 32], sizes = [8, 32], strides = [1, 1]} : vector<8x96xf32> to vector<8x32xf32>
    %60 = arith.addf %58, %59 : vector<8x32xf32>
    %61 = arith.negf %60 : vector<8x32xf32>
    %62 = math.exp %61 : vector<8x32xf32>
    %cst_20 = arith.constant 1.000000e+00 : f32
    %63 = vector.broadcast %cst_20 : f32 to vector<8x32xf32>
    %64 = arith.addf %63, %62 : vector<8x32xf32>
    %65 = arith.divf %63, %64 : vector<8x32xf32>
    %66 = vector.extract_strided_slice %49 {offsets = [0, 64], sizes = [8, 32], strides = [1, 1]} : vector<8x96xf32> to vector<8x32xf32>
    %67 = vector.extract_strided_slice %46 {offsets = [0, 64], sizes = [8, 32], strides = [1, 1]} : vector<8x96xf32> to vector<8x32xf32>
    %68 = arith.addf %67, %5 : vector<8x32xf32>
    %69 = arith.mulf %57, %68 : vector<8x32xf32>
    %70 = arith.addf %66, %69 : vector<8x32xf32>
    %71 = math.tanh %70 : vector<8x32xf32>
    %cst_21 = arith.constant 1.000000e+00 : f32
    %72 = vector.broadcast %cst_21 : f32 to vector<8x32xf32>
    %73 = arith.subf %72, %65 : vector<8x32xf32>
    %74 = arith.mulf %73, %71 : vector<8x32xf32>
    %75 = arith.mulf %65, %39 : vector<8x32xf32>
    %76 = arith.addf %74, %75 : vector<8x32xf32>
    %77 = arith.index_cast %c1_i32 : i32 to index
    %c0_22 = arith.constant 0 : index
    %c0_23 = arith.constant 0 : index
    %78 = vector.load %arg11[%77, %c0_22, %c0_23] : memref<8x8x32xf32, #tpu.memory_space<vmem>>, vector<1x8x32xf32>
    %79 = vector.shape_cast %78 : vector<1x8x32xf32> to vector<8x32xf32>
    %80 = vector.shape_cast %76 : vector<8x32xf32> to vector<1x8x32xf32>
    tpu.vector_store %arg11[%77, %c0_22, %c0_23], %80 {strides = array<i32>} : memref<8x8x32xf32, #tpu.memory_space<vmem>>, vector<1x8x32xf32>,
    %c2_i32 = arith.constant 2 : i32
    %81 = arith.truncf %76 : vector<8x32xf32> to vector<8x32xbf16>
    %c0_24 = arith.constant 0 : index
    %c0_25 = arith.constant 0 : index
    %82 = vector.load %arg4[%c0_24, %c0_25] : memref<32x96xbf16, #tpu.memory_space<vmem>>, vector<32x96xbf16>
    %cst_26 = arith.constant dense<0.000000e+00> : vector<8x96xf32>
    %83 = tpu.matmul %81, %82, %cst_26 {dimension_numbers = #tpu.dot_dimension_numbers<[1], [0], [0], [1], [0, 0, 1, 1], [], []>} : vector<8x32xbf16>, vector<32x96xbf16>, vector<8x96xf32> -> vector<8x96xf32>
    %84 = arith.index_cast %c2_i32 : i32 to index
    %c0_27 = arith.constant 0 : index
    %c0_28 = arith.constant 0 : index
    %85 = vector.load %arg2[%84, %c0_27, %c0_28] : memref<8x8x96xf32, #tpu.memory_space<vmem>>, vector<1x8x96xf32>
    %86 = vector.shape_cast %85 : vector<1x8x96xf32> to vector<8x96xf32>
    %87 = vector.extract_strided_slice %86 {offsets = [0, 0], sizes = [8, 32], strides = [1, 1]} : vector<8x96xf32> to vector<8x32xf32>
    %88 = vector.extract_strided_slice %83 {offsets = [0, 0], sizes = [8, 32], strides = [1, 1]} : vector<8x96xf32> to vector<8x32xf32>
    %89 = arith.addf %87, %88 : vector<8x32xf32>
    %90 = arith.negf %89 : vector<8x32xf32>
    %91 = math.exp %90 : vector<8x32xf32>
    %cst_29 = arith.constant 1.000000e+00 : f32
    %92 = vector.broadcast %cst_29 : f32 to vector<8x32xf32>
    %93 = arith.addf %92, %91 : vector<8x32xf32>
    %94 = arith.divf %92, %93 : vector<8x32xf32>
    %95 = vector.extract_strided_slice %86 {offsets = [0, 32], sizes = [8, 32], strides = [1, 1]} : vector<8x96xf32> to vector<8x32xf32>
    %96 = vector.extract_strided_slice %83 {offsets = [0, 32], sizes = [8, 32], strides = [1, 1]} : vector<8x96xf32> to vector<8x32xf32>
    %97 = arith.addf %95, %96 : vector<8x32xf32>
    %98 = arith.negf %97 : vector<8x32xf32>
    %99 = math.exp %98 : vector<8x32xf32>
    %cst_30 = arith.constant 1.000000e+00 : f32
    %100 = vector.broadcast %cst_30 : f32 to vector<8x32xf32>
    %101 = arith.addf %100, %99 : vector<8x32xf32>
    %102 = arith.divf %100, %101 : vector<8x32xf32>
    %103 = vector.extract_strided_slice %86 {offsets = [0, 64], sizes = [8, 32], strides = [1, 1]} : vector<8x96xf32> to vector<8x32xf32>
    %104 = vector.extract_strided_slice %83 {offsets = [0, 64], sizes = [8, 32], strides = [1, 1]} : vector<8x96xf32> to vector<8x32xf32>
    %105 = arith.addf %104, %5 : vector<8x32xf32>
    %106 = arith.mulf %94, %105 : vector<8x32xf32>
    %107 = arith.addf %103, %106 : vector<8x32xf32>
    %108 = math.tanh %107 : vector<8x32xf32>
    %cst_31 = arith.constant 1.000000e+00 : f32
    %109 = vector.broadcast %cst_31 : f32 to vector<8x32xf32>
    %110 = arith.subf %109, %102 : vector<8x32xf32>
    %111 = arith.mulf %110, %108 : vector<8x32xf32>
    %112 = arith.mulf %102, %76 : vector<8x32xf32>
    %113 = arith.addf %111, %112 : vector<8x32xf32>
    %114 = arith.index_cast %c2_i32 : i32 to index
    %c0_32 = arith.constant 0 : index
    %c0_33 = arith.constant 0 : index
    %115 = vector.load %arg11[%114, %c0_32, %c0_33] : memref<8x8x32xf32, #tpu.memory_space<vmem>>, vector<1x8x32xf32>
    %116 = vector.shape_cast %115 : vector<1x8x32xf32> to vector<8x32xf32>
    %117 = vector.shape_cast %113 : vector<8x32xf32> to vector<1x8x32xf32>
    tpu.vector_store %arg11[%114, %c0_32, %c0_33], %117 {strides = array<i32>} : memref<8x8x32xf32, #tpu.memory_space<vmem>>, vector<1x8x32xf32>,
    %c3_i32 = arith.constant 3 : i32
    %118 = arith.truncf %113 : vector<8x32xf32> to vector<8x32xbf16>
    %c0_34 = arith.constant 0 : index
    %c0_35 = arith.constant 0 : index
    %119 = vector.load %arg4[%c0_34, %c0_35] : memref<32x96xbf16, #tpu.memory_space<vmem>>, vector<32x96xbf16>
    %cst_36 = arith.constant dense<0.000000e+00> : vector<8x96xf32>
    %120 = tpu.matmul %118, %119, %cst_36 {dimension_numbers = #tpu.dot_dimension_numbers<[1], [0], [0], [1], [0, 0, 1, 1], [], []>} : vector<8x32xbf16>, vector<32x96xbf16>, vector<8x96xf32> -> vector<8x96xf32>
    %121 = arith.index_cast %c3_i32 : i32 to index
    %c0_37 = arith.constant 0 : index
    %c0_38 = arith.constant 0 : index
    %122 = vector.load %arg2[%121, %c0_37, %c0_38] : memref<8x8x96xf32, #tpu.memory_space<vmem>>, vector<1x8x96xf32>
    %123 = vector.shape_cast %122 : vector<1x8x96xf32> to vector<8x96xf32>
    %124 = vector.extract_strided_slice %123 {offsets = [0, 0], sizes = [8, 32], strides = [1, 1]} : vector<8x96xf32> to vector<8x32xf32>
    %125 = vector.extract_strided_slice %120 {offsets = [0, 0], sizes = [8, 32], strides = [1, 1]} : vector<8x96xf32> to vector<8x32xf32>
    %126 = arith.addf %124, %125 : vector<8x32xf32>
    %127 = arith.negf %126 : vector<8x32xf32>
    %128 = math.exp %127 : vector<8x32xf32>
    %cst_39 = arith.constant 1.000000e+00 : f32
    %129 = vector.broadcast %cst_39 : f32 to vector<8x32xf32>
    %130 = arith.addf %129, %128 : vector<8x32xf32>
    %131 = arith.divf %129, %130 : vector<8x32xf32>
    %132 = vector.extract_strided_slice %123 {offsets = [0, 32], sizes = [8, 32], strides = [1, 1]} : vector<8x96xf32> to vector<8x32xf32>
    %133 = vector.extract_strided_slice %120 {offsets = [0, 32], sizes = [8, 32], strides = [1, 1]} : vector<8x96xf32> to vector<8x32xf32>
    %134 = arith.addf %132, %133 : vector<8x32xf32>
    %135 = arith.negf %134 : vector<8x32xf32>
    %136 = math.exp %135 : vector<8x32xf32>
    %cst_40 = arith.constant 1.000000e+00 : f32
    %137 = vector.broadcast %cst_40 : f32 to vector<8x32xf32>
    %138 = arith.addf %137, %136 : vector<8x32xf32>
    %139 = arith.divf %137, %138 : vector<8x32xf32>
    %140 = vector.extract_strided_slice %123 {offsets = [0, 64], sizes = [8, 32], strides = [1, 1]} : vector<8x96xf32> to vector<8x32xf32>
    %141 = vector.extract_strided_slice %120 {offsets = [0, 64], sizes = [8, 32], strides = [1, 1]} : vector<8x96xf32> to vector<8x32xf32>
    %142 = arith.addf %141, %5 : vector<8x32xf32>
    %143 = arith.mulf %131, %142 : vector<8x32xf32>
    %144 = arith.addf %140, %143 : vector<8x32xf32>
    %145 = math.tanh %144 : vector<8x32xf32>
    %cst_41 = arith.constant 1.000000e+00 : f32
    %146 = vector.broadcast %cst_41 : f32 to vector<8x32xf32>
    %147 = arith.subf %146, %139 : vector<8x32xf32>
    %148 = arith.mulf %147, %145 : vector<8x32xf32>
    %149 = arith.mulf %139, %113 : vector<8x32xf32>
    %150 = arith.addf %148, %149 : vector<8x32xf32>
    %151 = arith.index_cast %c3_i32 : i32 to index
    %c0_42 = arith.constant 0 : index
    %c0_43 = arith.constant 0 : index
    %152 = vector.load %arg11[%151, %c0_42, %c0_43] : memref<8x8x32xf32, #tpu.memory_space<vmem>>, vector<1x8x32xf32>
    %153 = vector.shape_cast %152 : vector<1x8x32xf32> to vector<8x32xf32>
    %154 = vector.shape_cast %150 : vector<8x32xf32> to vector<1x8x32xf32>
    tpu.vector_store %arg11[%151, %c0_42, %c0_43], %154 {strides = array<i32>} : memref<8x8x32xf32, #tpu.memory_space<vmem>>, vector<1x8x32xf32>,
    %c4_i32 = arith.constant 4 : i32
    %155 = arith.truncf %150 : vector<8x32xf32> to vector<8x32xbf16>
    %c0_44 = arith.constant 0 : index
    %c0_45 = arith.constant 0 : index
    %156 = vector.load %arg4[%c0_44, %c0_45] : memref<32x96xbf16, #tpu.memory_space<vmem>>, vector<32x96xbf16>
    %cst_46 = arith.constant dense<0.000000e+00> : vector<8x96xf32>
    %157 = tpu.matmul %155, %156, %cst_46 {dimension_numbers = #tpu.dot_dimension_numbers<[1], [0], [0], [1], [0, 0, 1, 1], [], []>} : vector<8x32xbf16>, vector<32x96xbf16>, vector<8x96xf32> -> vector<8x96xf32>
    %158 = arith.index_cast %c4_i32 : i32 to index
    %c0_47 = arith.constant 0 : index
    %c0_48 = arith.constant 0 : index
    %159 = vector.load %arg2[%158, %c0_47, %c0_48] : memref<8x8x96xf32, #tpu.memory_space<vmem>>, vector<1x8x96xf32>
    %160 = vector.shape_cast %159 : vector<1x8x96xf32> to vector<8x96xf32>
    %161 = vector.extract_strided_slice %160 {offsets = [0, 0], sizes = [8, 32], strides = [1, 1]} : vector<8x96xf32> to vector<8x32xf32>
    %162 = vector.extract_strided_slice %157 {offsets = [0, 0], sizes = [8, 32], strides = [1, 1]} : vector<8x96xf32> to vector<8x32xf32>
    %163 = arith.addf %161, %162 : vector<8x32xf32>
    %164 = arith.negf %163 : vector<8x32xf32>
    %165 = math.exp %164 : vector<8x32xf32>
    %cst_49 = arith.constant 1.000000e+00 : f32
    %166 = vector.broadcast %cst_49 : f32 to vector<8x32xf32>
    %167 = arith.addf %166, %165 : vector<8x32xf32>
    %168 = arith.divf %166, %167 : vector<8x32xf32>
    %169 = vector.extract_strided_slice %160 {offsets = [0, 32], sizes = [8, 32], strides = [1, 1]} : vector<8x96xf32> to vector<8x32xf32>
    %170 = vector.extract_strided_slice %157 {offsets = [0, 32], sizes = [8, 32], strides = [1, 1]} : vector<8x96xf32> to vector<8x32xf32>
    %171 = arith.addf %169, %170 : vector<8x32xf32>
    %172 = arith.negf %171 : vector<8x32xf32>
    %173 = math.exp %172 : vector<8x32xf32>
    %cst_50 = arith.constant 1.000000e+00 : f32
    %174 = vector.broadcast %cst_50 : f32 to vector<8x32xf32>
    %175 = arith.addf %174, %173 : vector<8x32xf32>
    %176 = arith.divf %174, %175 : vector<8x32xf32>
    %177 = vector.extract_strided_slice %160 {offsets = [0, 64], sizes = [8, 32], strides = [1, 1]} : vector<8x96xf32> to vector<8x32xf32>
    %178 = vector.extract_strided_slice %157 {offsets = [0, 64], sizes = [8, 32], strides = [1, 1]} : vector<8x96xf32> to vector<8x32xf32>
    %179 = arith.addf %178, %5 : vector<8x32xf32>
    %180 = arith.mulf %168, %179 : vector<8x32xf32>
    %181 = arith.addf %177, %180 : vector<8x32xf32>
    %182 = math.tanh %181 : vector<8x32xf32>
    %cst_51 = arith.constant 1.000000e+00 : f32
    %183 = vector.broadcast %cst_51 : f32 to vector<8x32xf32>
    %184 = arith.subf %183, %176 : vector<8x32xf32>
    %185 = arith.mulf %184, %182 : vector<8x32xf32>
    %186 = arith.mulf %176, %150 : vector<8x32xf32>
    %187 = arith.addf %185, %186 : vector<8x32xf32>
    %188 = arith.index_cast %c4_i32 : i32 to index
    %c0_52 = arith.constant 0 : index
    %c0_53 = arith.constant 0 : index
    %189 = vector.load %arg11[%188, %c0_52, %c0_53] : memref<8x8x32xf32, #tpu.memory_space<vmem>>, vector<1x8x32xf32>
    %190 = vector.shape_cast %189 : vector<1x8x32xf32> to vector<8x32xf32>
    %191 = vector.shape_cast %187 : vector<8x32xf32> to vector<1x8x32xf32>
    tpu.vector_store %arg11[%188, %c0_52, %c0_53], %191 {strides = array<i32>} : memref<8x8x32xf32, #tpu.memory_space<vmem>>, vector<1x8x32xf32>,
    %c5_i32 = arith.constant 5 : i32
    %192 = arith.truncf %187 : vector<8x32xf32> to vector<8x32xbf16>
    %c0_54 = arith.constant 0 : index
    %c0_55 = arith.constant 0 : index
    %193 = vector.load %arg4[%c0_54, %c0_55] : memref<32x96xbf16, #tpu.memory_space<vmem>>, vector<32x96xbf16>
    %cst_56 = arith.constant dense<0.000000e+00> : vector<8x96xf32>
    %194 = tpu.matmul %192, %193, %cst_56 {dimension_numbers = #tpu.dot_dimension_numbers<[1], [0], [0], [1], [0, 0, 1, 1], [], []>} : vector<8x32xbf16>, vector<32x96xbf16>, vector<8x96xf32> -> vector<8x96xf32>
    %195 = arith.index_cast %c5_i32 : i32 to index
    %c0_57 = arith.constant 0 : index
    %c0_58 = arith.constant 0 : index
    %196 = vector.load %arg2[%195, %c0_57, %c0_58] : memref<8x8x96xf32, #tpu.memory_space<vmem>>, vector<1x8x96xf32>
    %197 = vector.shape_cast %196 : vector<1x8x96xf32> to vector<8x96xf32>
    %198 = vector.extract_strided_slice %197 {offsets = [0, 0], sizes = [8, 32], strides = [1, 1]} : vector<8x96xf32> to vector<8x32xf32>
    %199 = vector.extract_strided_slice %194 {offsets = [0, 0], sizes = [8, 32], strides = [1, 1]} : vector<8x96xf32> to vector<8x32xf32>
    %200 = arith.addf %198, %199 : vector<8x32xf32>
    %201 = arith.negf %200 : vector<8x32xf32>
    %202 = math.exp %201 : vector<8x32xf32>
    %cst_59 = arith.constant 1.000000e+00 : f32
    %203 = vector.broadcast %cst_59 : f32 to vector<8x32xf32>
    %204 = arith.addf %203, %202 : vector<8x32xf32>
    %205 = arith.divf %203, %204 : vector<8x32xf32>
    %206 = vector.extract_strided_slice %197 {offsets = [0, 32], sizes = [8, 32], strides = [1, 1]} : vector<8x96xf32> to vector<8x32xf32>
    %207 = vector.extract_strided_slice %194 {offsets = [0, 32], sizes = [8, 32], strides = [1, 1]} : vector<8x96xf32> to vector<8x32xf32>
    %208 = arith.addf %206, %207 : vector<8x32xf32>
    %209 = arith.negf %208 : vector<8x32xf32>
    %210 = math.exp %209 : vector<8x32xf32>
    %cst_60 = arith.constant 1.000000e+00 : f32
    %211 = vector.broadcast %cst_60 : f32 to vector<8x32xf32>
    %212 = arith.addf %211, %210 : vector<8x32xf32>
    %213 = arith.divf %211, %212 : vector<8x32xf32>
    %214 = vector.extract_strided_slice %197 {offsets = [0, 64], sizes = [8, 32], strides = [1, 1]} : vector<8x96xf32> to vector<8x32xf32>
    %215 = vector.extract_strided_slice %194 {offsets = [0, 64], sizes = [8, 32], strides = [1, 1]} : vector<8x96xf32> to vector<8x32xf32>
    %216 = arith.addf %215, %5 : vector<8x32xf32>
    %217 = arith.mulf %205, %216 : vector<8x32xf32>
    %218 = arith.addf %214, %217 : vector<8x32xf32>
    %219 = math.tanh %218 : vector<8x32xf32>
    %cst_61 = arith.constant 1.000000e+00 : f32
    %220 = vector.broadcast %cst_61 : f32 to vector<8x32xf32>
    %221 = arith.subf %220, %213 : vector<8x32xf32>
    %222 = arith.mulf %221, %219 : vector<8x32xf32>
    %223 = arith.mulf %213, %187 : vector<8x32xf32>
    %224 = arith.addf %222, %223 : vector<8x32xf32>
    %225 = arith.index_cast %c5_i32 : i32 to index
    %c0_62 = arith.constant 0 : index
    %c0_63 = arith.constant 0 : index
    %226 = vector.load %arg11[%225, %c0_62, %c0_63] : memref<8x8x32xf32, #tpu.memory_space<vmem>>, vector<1x8x32xf32>
    %227 = vector.shape_cast %226 : vector<1x8x32xf32> to vector<8x32xf32>
    %228 = vector.shape_cast %224 : vector<8x32xf32> to vector<1x8x32xf32>
    tpu.vector_store %arg11[%225, %c0_62, %c0_63], %228 {strides = array<i32>} : memref<8x8x32xf32, #tpu.memory_space<vmem>>, vector<1x8x32xf32>,
    %c6_i32 = arith.constant 6 : i32
    %229 = arith.truncf %224 : vector<8x32xf32> to vector<8x32xbf16>
    %c0_64 = arith.constant 0 : index
    %c0_65 = arith.constant 0 : index
    %230 = vector.load %arg4[%c0_64, %c0_65] : memref<32x96xbf16, #tpu.memory_space<vmem>>, vector<32x96xbf16>
    %cst_66 = arith.constant dense<0.000000e+00> : vector<8x96xf32>
    %231 = tpu.matmul %229, %230, %cst_66 {dimension_numbers = #tpu.dot_dimension_numbers<[1], [0], [0], [1], [0, 0, 1, 1], [], []>} : vector<8x32xbf16>, vector<32x96xbf16>, vector<8x96xf32> -> vector<8x96xf32>
    %232 = arith.index_cast %c6_i32 : i32 to index
    %c0_67 = arith.constant 0 : index
    %c0_68 = arith.constant 0 : index
    %233 = vector.load %arg2[%232, %c0_67, %c0_68] : memref<8x8x96xf32, #tpu.memory_space<vmem>>, vector<1x8x96xf32>
    %234 = vector.shape_cast %233 : vector<1x8x96xf32> to vector<8x96xf32>
    %235 = vector.extract_strided_slice %234 {offsets = [0, 0], sizes = [8, 32], strides = [1, 1]} : vector<8x96xf32> to vector<8x32xf32>
    %236 = vector.extract_strided_slice %231 {offsets = [0, 0], sizes = [8, 32], strides = [1, 1]} : vector<8x96xf32> to vector<8x32xf32>
    %237 = arith.addf %235, %236 : vector<8x32xf32>
    %238 = arith.negf %237 : vector<8x32xf32>
    %239 = math.exp %238 : vector<8x32xf32>
    %cst_69 = arith.constant 1.000000e+00 : f32
    %240 = vector.broadcast %cst_69 : f32 to vector<8x32xf32>
    %241 = arith.addf %240, %239 : vector<8x32xf32>
    %242 = arith.divf %240, %241 : vector<8x32xf32>
    %243 = vector.extract_strided_slice %234 {offsets = [0, 32], sizes = [8, 32], strides = [1, 1]} : vector<8x96xf32> to vector<8x32xf32>
    %244 = vector.extract_strided_slice %231 {offsets = [0, 32], sizes = [8, 32], strides = [1, 1]} : vector<8x96xf32> to vector<8x32xf32>
    %245 = arith.addf %243, %244 : vector<8x32xf32>
    %246 = arith.negf %245 : vector<8x32xf32>
    %247 = math.exp %246 : vector<8x32xf32>
    %cst_70 = arith.constant 1.000000e+00 : f32
    %248 = vector.broadcast %cst_70 : f32 to vector<8x32xf32>
    %249 = arith.addf %248, %247 : vector<8x32xf32>
    %250 = arith.divf %248, %249 : vector<8x32xf32>
    %251 = vector.extract_strided_slice %234 {offsets = [0, 64], sizes = [8, 32], strides = [1, 1]} : vector<8x96xf32> to vector<8x32xf32>
    %252 = vector.extract_strided_slice %231 {offsets = [0, 64], sizes = [8, 32], strides = [1, 1]} : vector<8x96xf32> to vector<8x32xf32>
    %253 = arith.addf %252, %5 : vector<8x32xf32>
    %254 = arith.mulf %242, %253 : vector<8x32xf32>
    %255 = arith.addf %251, %254 : vector<8x32xf32>
    %256 = math.tanh %255 : vector<8x32xf32>
    %cst_71 = arith.constant 1.000000e+00 : f32
    %257 = vector.broadcast %cst_71 : f32 to vector<8x32xf32>
    %258 = arith.subf %257, %250 : vector<8x32xf32>
    %259 = arith.mulf %258, %256 : vector<8x32xf32>
    %260 = arith.mulf %250, %224 : vector<8x32xf32>
    %261 = arith.addf %259, %260 : vector<8x32xf32>
    %262 = arith.index_cast %c6_i32 : i32 to index
    %c0_72 = arith.constant 0 : index
    %c0_73 = arith.constant 0 : index
    %263 = vector.load %arg11[%262, %c0_72, %c0_73] : memref<8x8x32xf32, #tpu.memory_space<vmem>>, vector<1x8x32xf32>
    %264 = vector.shape_cast %263 : vector<1x8x32xf32> to vector<8x32xf32>
    %265 = vector.shape_cast %261 : vector<8x32xf32> to vector<1x8x32xf32>
    tpu.vector_store %arg11[%262, %c0_72, %c0_73], %265 {strides = array<i32>} : memref<8x8x32xf32, #tpu.memory_space<vmem>>, vector<1x8x32xf32>,
    %c7_i32 = arith.constant 7 : i32
    %266 = arith.truncf %261 : vector<8x32xf32> to vector<8x32xbf16>
    %c0_74 = arith.constant 0 : index
    %c0_75 = arith.constant 0 : index
    %267 = vector.load %arg4[%c0_74, %c0_75] : memref<32x96xbf16, #tpu.memory_space<vmem>>, vector<32x96xbf16>
    %cst_76 = arith.constant dense<0.000000e+00> : vector<8x96xf32>
    %268 = tpu.matmul %266, %267, %cst_76 {dimension_numbers = #tpu.dot_dimension_numbers<[1], [0], [0], [1], [0, 0, 1, 1], [], []>} : vector<8x32xbf16>, vector<32x96xbf16>, vector<8x96xf32> -> vector<8x96xf32>
    %269 = arith.index_cast %c7_i32 : i32 to index
    %c0_77 = arith.constant 0 : index
    %c0_78 = arith.constant 0 : index
    %270 = vector.load %arg2[%269, %c0_77, %c0_78] : memref<8x8x96xf32, #tpu.memory_space<vmem>>, vector<1x8x96xf32>
    %271 = vector.shape_cast %270 : vector<1x8x96xf32> to vector<8x96xf32>
    %272 = vector.extract_strided_slice %271 {offsets = [0, 0], sizes = [8, 32], strides = [1, 1]} : vector<8x96xf32> to vector<8x32xf32>
    %273 = vector.extract_strided_slice %268 {offsets = [0, 0], sizes = [8, 32], strides = [1, 1]} : vector<8x96xf32> to vector<8x32xf32>
    %274 = arith.addf %272, %273 : vector<8x32xf32>
    %275 = arith.negf %274 : vector<8x32xf32>
    %276 = math.exp %275 : vector<8x32xf32>
    %cst_79 = arith.constant 1.000000e+00 : f32
    %277 = vector.broadcast %cst_79 : f32 to vector<8x32xf32>
    %278 = arith.addf %277, %276 : vector<8x32xf32>
    %279 = arith.divf %277, %278 : vector<8x32xf32>
    %280 = vector.extract_strided_slice %271 {offsets = [0, 32], sizes = [8, 32], strides = [1, 1]} : vector<8x96xf32> to vector<8x32xf32>
    %281 = vector.extract_strided_slice %268 {offsets = [0, 32], sizes = [8, 32], strides = [1, 1]} : vector<8x96xf32> to vector<8x32xf32>
    %282 = arith.addf %280, %281 : vector<8x32xf32>
    %283 = arith.negf %282 : vector<8x32xf32>
    %284 = math.exp %283 : vector<8x32xf32>
    %cst_80 = arith.constant 1.000000e+00 : f32
    %285 = vector.broadcast %cst_80 : f32 to vector<8x32xf32>
    %286 = arith.addf %285, %284 : vector<8x32xf32>
    %287 = arith.divf %285, %286 : vector<8x32xf32>
    %288 = vector.extract_strided_slice %271 {offsets = [0, 64], sizes = [8, 32], strides = [1, 1]} : vector<8x96xf32> to vector<8x32xf32>
    %289 = vector.extract_strided_slice %268 {offsets = [0, 64], sizes = [8, 32], strides = [1, 1]} : vector<8x96xf32> to vector<8x32xf32>
    %290 = arith.addf %289, %5 : vector<8x32xf32>
    %291 = arith.mulf %279, %290 : vector<8x32xf32>
    %292 = arith.addf %288, %291 : vector<8x32xf32>
    %293 = math.tanh %292 : vector<8x32xf32>
    %cst_81 = arith.constant 1.000000e+00 : f32
    %294 = vector.broadcast %cst_81 : f32 to vector<8x32xf32>
    %295 = arith.subf %294, %287 : vector<8x32xf32>
    %296 = arith.mulf %295, %293 : vector<8x32xf32>
    %297 = arith.mulf %287, %261 : vector<8x32xf32>
    %298 = arith.addf %296, %297 : vector<8x32xf32>
    %299 = arith.index_cast %c7_i32 : i32 to index
    %c0_82 = arith.constant 0 : index
    %c0_83 = arith.constant 0 : index
    %300 = vector.load %arg11[%299, %c0_82, %c0_83] : memref<8x8x32xf32, #tpu.memory_space<vmem>>, vector<1x8x32xf32>
    %301 = vector.shape_cast %300 : vector<1x8x32xf32> to vector<8x32xf32>
    %302 = vector.shape_cast %298 : vector<8x32xf32> to vector<1x8x32xf32>
    tpu.vector_store %arg11[%299, %c0_82, %c0_83], %302 {strides = array<i32>} : memref<8x8x32xf32, #tpu.memory_space<vmem>>, vector<1x8x32xf32>,
    %c8_i32 = arith.constant 8 : i32
    %c0_84 = arith.constant 0 : index
    %c0_85 = arith.constant 0 : index
    %303 = vector.load %arg10[%c0_84, %c0_85] : memref<8x32xf32, #tpu.memory_space<vmem>>, vector<8x32xf32>
    tpu.vector_store %arg10[%c0_84, %c0_85], %298 {strides = array<i32>} : memref<8x32xf32, #tpu.memory_space<vmem>>, vector<8x32xf32>,
    %c0_86 = arith.constant 0 : index
    %c0_87 = arith.constant 0 : index
    %c0_88 = arith.constant 0 : index
    %304 = vector.load %arg11[%c0_86, %c0_87, %c0_88] : memref<8x8x32xf32, #tpu.memory_space<vmem>>, vector<8x8x32xf32>
    %305 = vector.shape_cast %304 : vector<8x8x32xf32> to vector<64x32xf32>
    %306 = arith.truncf %305 : vector<64x32xf32> to vector<64x32xbf16>
    %c0_89 = arith.constant 0 : index
    %c0_90 = arith.constant 0 : index
    %307 = vector.load %arg6[%c0_89, %c0_90] : memref<32x16xbf16, #tpu.memory_space<vmem>>, vector<32x16xbf16>
    %cst_91 = arith.constant dense<0.000000e+00> : vector<64x16xf32>
    %308 = tpu.matmul %306, %307, %cst_91 {dimension_numbers = #tpu.dot_dimension_numbers<[1], [0], [0], [1], [0, 0, 1, 1], [], []>} : vector<64x32xbf16>, vector<32x16xbf16>, vector<64x16xf32> -> vector<64x16xf32>
    %c0_92 = arith.constant 0 : index
    %c0_93 = arith.constant 0 : index
    %309 = vector.load %arg7[%c0_92, %c0_93] : memref<1x16xf32, #tpu.memory_space<vmem>>, vector<1x16xf32>
    %310 = vector.broadcast %309 : vector<1x16xf32> to vector<64x16xf32>
    %311 = arith.addf %308, %310 : vector<64x16xf32>
    %312 = vector.shape_cast %311 : vector<64x16xf32> to vector<8x8x16xf32>
    %c0_94 = arith.constant 0 : index
    %c0_95 = arith.constant 0 : index
    %c0_96 = arith.constant 0 : index
    %313 = vector.load %arg8[%c0_94, %c0_95, %c0_96] : memref<8x8x16xf32, #tpu.memory_space<vmem>>, vector<8x8x16xf32>
    tpu.vector_store %arg8[%c0_94, %c0_95, %c0_96], %312 {strides = array<i32>} : memref<8x8x16xf32, #tpu.memory_space<vmem>>, vector<8x8x16xf32>,
    %c0_i32_97 = arith.constant 0 : i32
    %314 = arith.cmpi eq, %arg1, %c0_i32_97 : i32
    %315 = arith.extui %314 : i1 to i32
    %c0_i32_98 = arith.constant 0 : i32
    %316 = arith.cmpi ne, %315, %c0_i32_98 : i32
    scf.if %316 {
      %c0_99 = arith.constant 0 : index
      %c0_100 = arith.constant 0 : index
      %317 = vector.load %arg9[%c0_99, %c0_100] : memref<8x32xf32, #tpu.memory_space<vmem>>, vector<8x32xf32>
      tpu.vector_store %arg9[%c0_99, %c0_100], %298 {strides = array<i32>} : memref<8x32xf32, #tpu.memory_space<vmem>>, vector<8x32xf32>,
    } else {
    }
    return
  }
  func.func @transform_0(%arg0: i32, %arg1: i32) -> (i32, i32, i32) {
    %c0_i32 = arith.constant 0 : i32
    %c0_i32_0 = arith.constant 0 : i32
    return %arg1, %arg0, %c0_i32 : i32, i32, i32
  }
  func.func @transform_1(%arg0: i32, %arg1: i32) -> (i32, i32) {
    %c0_i32 = arith.constant 0 : i32
    %c0_i32_0 = arith.constant 0 : i32
    return %arg0, %c0_i32 : i32, i32
  }
  func.func @transform_2(%arg0: i32, %arg1: i32) -> (i32, i32) {
    %c0_i32 = arith.constant 0 : i32
    %c0_i32_0 = arith.constant 0 : i32
    %c0_i32_1 = arith.constant 0 : i32
    return %c0_i32, %c0_i32_0 : i32, i32
  }
  func.func @transform_3(%arg0: i32, %arg1: i32) -> (i32, i32) {
    %c0_i32 = arith.constant 0 : i32
    %c0_i32_0 = arith.constant 0 : i32
    %c0_i32_1 = arith.constant 0 : i32
    return %c0_i32, %c0_i32_0 : i32, i32
  }
  func.func @transform_4(%arg0: i32, %arg1: i32) -> (i32, i32) {
    %c0_i32 = arith.constant 0 : i32
    %c0_i32_0 = arith.constant 0 : i32
    %c0_i32_1 = arith.constant 0 : i32
    return %c0_i32, %c0_i32_0 : i32, i32
  }
  func.func @transform_5(%arg0: i32, %arg1: i32) -> (i32, i32) {
    %c0_i32 = arith.constant 0 : i32
    %c0_i32_0 = arith.constant 0 : i32
    %c0_i32_1 = arith.constant 0 : i32
    return %c0_i32, %c0_i32_0 : i32, i32
  }
  func.func @transform_6(%arg0: i32, %arg1: i32) -> (i32, i32, i32) {
    %c0_i32 = arith.constant 0 : i32
    %c0_i32_0 = arith.constant 0 : i32
    return %arg1, %arg0, %c0_i32 : i32, i32, i32
  }
  func.func @transform_7(%arg0: i32, %arg1: i32) -> (i32, i32) {
    %c0_i32 = arith.constant 0 : i32
    %c0_i32_0 = arith.constant 0 : i32
    return %arg0, %c0_i32 : i32, i32
  }
}

</mosaic_0001>

<bundles_post_ra>
// kernel: tpu_custom_call.1
= control target key start
LH: loop header
LB: loop body
LE: loop exit
PB: predicated region body
PF: predicated region fallthrough
CT: control target
= control target key end

     0   :  { %13 = vsyncpa [#allocation5], 0  ;;  %s1349_s0 = inlined_call_operand.hbm [shape: f32[8,8,96], index: 0, kind: input, shape index: {}]   ;;  %s1350_s1 = inlined_call_operand.vmem [shape: f32[8,32], index: 1, kind: input, shape index: {}]   ;;  %s1351_s2 = inlined_call_operand.vmem [shape: bf16[32,96], index: 2, kind: input, shape index: {}]   ;;  %s1352_s3 = inlined_call_operand.vmem [shape: f32[1,32], index: 3, kind: input, shape index: {}]   ;;  %s1353_s4 = inlined_call_operand.vmem [shape: bf16[32,16], index: 4, kind: input, shape index: {}]   ;;  %s1354_s5 = inlined_call_operand.vmem [shape: f32[1,16], index: 5, kind: input, shape index: {}]   ;;  %s1355_s6 = inlined_call_operand.hbm [shape: f32[8,8,16], index: 6, kind: output, shape index: {0}]   ;;  %s1356_s7 = inlined_call_operand.hbm [shape: f32[8,32], index: 7, kind: output, shape index: {1}]  }
   0x1   :  { %14 = vsyncpa [#allocation6], 0 }
   0x2   :  { %15 = vsyncpa [#allocation9], 0  ;;  %s20_s26 = sshll.u32 %s1349_s0, 4  ;;  %s1100_s27 = smov [#allocation4]   ;;  %s21_s26 = int_to_ptr.hbm [resolvable:$true] %s20_s26 }
   0x3   :  { %s22_s28 = sshll.u32 %s1100_s27, 4  ;;  %s1101_s29 = smov 128   ;;  %s23_s28 = int_to_ptr.vmem [resolvable:$true] %s22_s28 }
   0x4   :  { %s1102_s30 = smov 8  }
   0x5   :  { %28 = dma.hbm_to_vmem [thread:$0]  %s21_s26, 1024, %s23_s28, [#allocation5], %s1101_s29, %s1101_s29, %s1102_s30  }
   0x6   :  { %1094 = dma.done.wait [#allocation5], 1024  }
   0x7   :  { %1095 = vsyncadd [#allocation5], 4294966272  ;;  %vm49_vm0 = vcmask 261120   ;;  %v945_v0 = vld [vmem:[%s1351_s2 + $0x8] sm:$0xff]  ;;  %v48_v1 = vld [vmem:[%s1350_s1] sm:$0xff]  ;;  %s1103_s15 = smov 64  }
   0x8   :  { %50 = vst.msk [vmem:[#allocation2] sm:$0xff] %vm49_vm0, %v48_v1  ;;  %v972_v2 = vld [vmem:[%s1352_s3] ss:$0 sm:$0xff]  ;;  %82 = vmatpush.bf16.msra.mxu1 %v945_v0  ;;  %s1104_s16 = smov 32   ;;  %v89_v10 = vld [vmem:[#allocation4] sm:$0xff]  ;;  %s1105_s1 = smov 96  }
   0x9   :  { %v944_v3 = vld [vmem:[%s1351_s2] sm:$0xff]  ;;  %110 = vrot.lane.b32.xlu0 %v972_v2, %s1103_s15  ;;  %v947_v30 = vld [vmem:[%s1351_s2 + $0x8] sm:$0xff]  ;;  %v179_v43 = vld [vmem:[#allocation4 + $0x8] sm:$0xff]  ;;  %s837_s27 = sshll.u32 %s1356_s7, 4  ;;  %s1107_s7 = smov [#allocation7]   ;;  %s838_s27 = int_to_ptr.hbm [resolvable:$true] %s837_s27 }
   0xa   :  { %v946_v31 = vld [vmem:[%s1351_s2] sm:$0xff]  ;;  %v949_v63 = vld [vmem:[%s1351_s2 + $0x8] sm:$0xff]  ;;  %s821_s28 = sshll.u32 %s1107_s7, 4  ;;  %s823_s10 = sshll.u32 %s1355_s6, 4  ;;  %s822_s28 = int_to_ptr.vmem [resolvable:$true] %s821_s28  ;;  %s824_s10 = int_to_ptr.hbm [resolvable:$true] %s823_s10 }
   0xb   :  { %255 = vmatpush.bf16.msra.mxu2 %v949_v63  ;;  %v948_v0 = vld [vmem:[%s1351_s2] sm:$0xff] }
   0xc   :  { %83 = vmatpush.bf16.msra.mxu1 %v944_v3 }
   0xf   :  { %v54_v4 = vld [vmem:[#allocation2] sm:$0xff]  ;;  %256 = vmatpush.bf16.msra.mxu2 %v948_v0 }
  0x10   :  { %v55_v5 = vpack.c.bf16 %v54_v4, %v54_v4  ;;  %132 = vrot.lane.b32.xlu2 %v54_v4, %s1104_s16  ;;  %171 = vmatpush.bf16.msrb.mxu1 %v947_v30 }
  0x12   :  { %860 = vmatmul.msk.bf16.vlgmr.msra.gmra.mxu1 %vm49_vm0, %v55_v5 }
  0x14   :  { %172 = vmatpush.bf16.msrb.mxu1 %v946_v31 }
  0x6a   :  { %v133_v32 = vpop.permute.xlu2 %132 }
  0x7b   :  { %v1169_v6 = vpop.permute.xlu0 %110 }
  0x8f   :  { %v85_v7 = vpop.f32.mrf.mxu1 }
  0x90   :  { %v113_v8 = vadd.f32 %v1169_v6, %v85_v7  ;;  %v90_v11 = vadd.f32 %v89_v10, %v85_v7 }
  0x92   :  { %115 = vrot.lane.b32.xlu0 %v113_v8, %s1103_s15  ;;  %v861_v12 = vmul.f32 -1.442695, %v90_v11 }
  0x94   :  { %974 = vpow2.f32 %v861_v12  ;;  %v263_v12 = vld [vmem:[#allocation4 + $0x10] sm:$0xff] }
  0x97   :  { %v87_v9 = vpop.f32.mrf.mxu1 }
  0x9a   :  { %v975_v13 = vpop.eup %974 }
  0x9b   :  { %v94_v14 = vadd.f32 1.0, %v975_v13 }
  0x9d   :  { %976 = vrcp.f32 %v94_v14  ;;  %v106_v20 = vand.u32 2147483648, %v94_v14  ;;  %vm100_vm2 = vweird.f32 %v94_v14  ;;  %v104_v21 = vand.u32 2147483647, %v94_v14 }
  0x9f   :  { %v107_v23 = vor.u32 1.1754944e-38, %v106_v20  ;;  %vm105_vm4 = vcmp.eq.f32.partialorder %v104_v21, 8.507059e+37 }
  0xa3   :  { %v977_v15 = vpop.eup %976 }
  0xa4   :  { %v96_v16 = vmul.f32 %v977_v15, %v94_v14  ;;  %vm101_vm1 = vweird.f32 %v977_v15 }
  0xa5   :  { %vm102_vm3 = vmor %vm100_vm2, %vm101_vm1 }
  0xa6   :  { %v97_v17 = vsub.f32 1.0, %v96_v16 }
  0xa8   :  { %v98_v18 = vmul.f32 %v977_v15, %v97_v17 }
  0xaa   :  { %v99_v19 = vadd.f32 %v977_v15, %v98_v18 }
  0xac   :  { %v103_v22 = vsel %vm102_vm3, %v977_v15, %v99_v19 }
  0xad   :  { %v108_v24 = vsel %vm105_vm4, %v107_v23, %v103_v22 }
  0xae   :  { %v125_v33 = vsub.f32 1.0, %v108_v24  ;;  %v135_v35 = vmul.f32 %v133_v32, %v108_v24  ;;  %v951_v32 = vld [vmem:[%s1351_s2 + $0x8] sm:$0xff] }
  0xaf   :  { %339 = vmatpush.bf16.msra.mxu3 %v951_v32 }
 0x104   :  { %v116_v25 = vpop.permute.xlu0 %115 }
 0x105   :  { %v118_v26 = vmul.f32 %v116_v25, %v108_v24 }
 0x107   :  { %120 = vrot.lane.b32.xlu1 %v118_v26, %s1103_s15 }
 0x179   :  { %v121_v27 = vpop.permute.xlu1 %120 }
 0x17a   :  { %v123_v28 = vadd.f32 %v121_v27, %v89_v10 }
 0x17c   :  { %978 = vtanh.f32 %v123_v28 }
 0x182   :  { %v979_v29 = vpop.eup %978 }
 0x183   :  { %127 = vrot.lane.b32.xlu1 %v979_v29, %s1105_s1 }
 0x1f5   :  { %v128_v34 = vpop.permute.xlu1 %127 }
 0x1f6   :  { %v130_v36 = vmul.f32 %v128_v34, %v125_v33  ;;  %v950_v33 = vld [vmem:[%s1351_s2] sm:$0xff] }
 0x1f7   :  { %340 = vmatpush.bf16.msra.mxu3 %v950_v33 }
 0x1f8   :  { %v1181_v37 = vadd.f32 %v135_v35, %v130_v36 }
 0x1fa   :  { %v142_v38 = vpack.c.bf16 %v1181_v37, %v1181_v37 }
 0x1fc   :  { %148 = vrot.lane.b32.xlu2 %v142_v38, %s1105_s1 }
 0x256   :  { %v149_v39 = vpop.permute.xlu2 %148 }
 0x257   :  { %870 = vmatmul.msk.bf16.vlgmr.msrb.gmra.mxu1 %vm49_vm0, %v149_v39 }
 0x2d4   :  { %v174_v40 = vpop.f32.mrf.mxu1 }
 0x2d5   :  { %v200_v41 = vadd.f32 %v174_v40, %v1169_v6  ;;  %v180_v44 = vadd.f32 %v179_v43, %v174_v40 }
 0x2d7   :  { %202 = vrot.lane.b32.xlu0 %v200_v41, %s1103_s15  ;;  %v871_v45 = vmul.f32 -1.442695, %v180_v44 }
 0x2d9   :  { %980 = vpow2.f32 %v871_v45  ;;  %v347_v45 = vld [vmem:[#allocation4 + $0x18] sm:$0xff] }
 0x2dc   :  { %v176_v42 = vpop.f32.mrf.mxu1 }
 0x2df   :  { %v981_v46 = vpop.eup %980 }
 0x2e0   :  { %v184_v47 = vadd.f32 1.0, %v981_v46 }
 0x2e2   :  { %982 = vrcp.f32 %v184_v47  ;;  %v196_v53 = vand.u32 2147483648, %v184_v47  ;;  %vm190_vm6 = vweird.f32 %v184_v47  ;;  %v194_v54 = vand.u32 2147483647, %v184_v47 }
 0x2e4   :  { %v197_v56 = vor.u32 1.1754944e-38, %v196_v53  ;;  %vm195_vm8 = vcmp.eq.f32.partialorder %v194_v54, 8.507059e+37 }
 0x2e8   :  { %v983_v48 = vpop.eup %982 }
 0x2e9   :  { %v186_v49 = vmul.f32 %v983_v48, %v184_v47  ;;  %vm191_vm5 = vweird.f32 %v983_v48 }
 0x2ea   :  { %vm192_vm7 = vmor %vm190_vm6, %vm191_vm5 }
 0x2eb   :  { %v187_v50 = vsub.f32 1.0, %v186_v49 }
 0x2ed   :  { %v188_v51 = vmul.f32 %v983_v48, %v187_v50 }
 0x2ef   :  { %v189_v52 = vadd.f32 %v983_v48, %v188_v51 }
 0x2f1   :  { %v193_v55 = vsel %vm192_vm7, %v983_v48, %v189_v52 }
 0x2f2   :  { %v198_v58 = vsel %vm195_vm8, %v197_v56, %v193_v55 }
 0x2f3   :  { %v212_v1 = vsub.f32 1.0, %v198_v58  ;;  %v218_v3 = vmul.f32 %v198_v58, %v1181_v37 }
 0x349   :  { %v203_v57 = vpop.permute.xlu0 %202 }
 0x34a   :  { %v205_v59 = vmul.f32 %v203_v57, %v198_v58 }
 0x34c   :  { %207 = vrot.lane.b32.xlu1 %v205_v59, %s1103_s15 }
 0x3be   :  { %v208_v60 = vpop.permute.xlu1 %207 }
 0x3bf   :  { %v210_v61 = vadd.f32 %v208_v60, %v179_v43 }
 0x3c1   :  { %984 = vtanh.f32 %v210_v61 }
 0x3c7   :  { %v985_v62 = vpop.eup %984 }
 0x3c8   :  { %214 = vrot.lane.b32.xlu2 %v985_v62, %s1105_s1 }
 0x422   :  { %v215_v2 = vpop.permute.xlu2 %214 }
 0x423   :  { %v217_v4 = vmul.f32 %v215_v2, %v212_v1  ;;  %v953_v1 = vld [vmem:[%s1351_s2 + $0x8] sm:$0xff]  ;;  %v952_v2 = vld [vmem:[%s1351_s2] sm:$0xff] }
 0x424   :  { %423 = vmatpush.bf16.msrb.mxu2 %v953_v1 }
 0x425   :  { %v1198_v5 = vadd.f32 %v218_v3, %v217_v4 }
 0x427   :  { %v226_v7 = vpack.c.bf16 %v1198_v5, %v1198_v5 }
 0x428   :  { %424 = vmatpush.bf16.msrb.mxu2 %v952_v2 }
 0x429   :  { %232 = vrot.lane.b32.xlu0 %v226_v7, %s1105_s1 }
 0x49b   :  { %v233_v8 = vpop.permute.xlu0 %232 }
 0x49c   :  { %880 = vmatmul.msk.bf16.vlgmr.msra.gmra.mxu2 %vm49_vm0, %v233_v8 }
 0x51f   :  { %v258_v9 = vpop.f32.mrf.mxu2 }
 0x520   :  { %v284_v10 = vadd.f32 %v258_v9, %v1169_v6  ;;  %v264_v13 = vadd.f32 %v263_v12, %v258_v9 }
 0x522   :  { %286 = vrot.lane.b32.xlu1 %v284_v10, %s1103_s15  ;;  %v881_v14 = vmul.f32 -1.442695, %v264_v13 }
 0x524   :  { %986 = vpow2.f32 %v881_v14 }
 0x527   :  { %v260_v11 = vpop.f32.mrf.mxu2 }
 0x52a   :  { %v987_v15 = vpop.eup %986 }
 0x52b   :  { %v268_v16 = vadd.f32 1.0, %v987_v15  ;;  %v431_v15 = vld [vmem:[#allocation4 + $0x20] sm:$0xff] }
 0x52d   :  { %988 = vrcp.f32 %v268_v16  ;;  %v280_v22 = vand.u32 2147483648, %v268_v16  ;;  %vm274_vm10 = vweird.f32 %v268_v16  ;;  %v278_v23 = vand.u32 2147483647, %v268_v16 }
 0x52f   :  { %v281_v25 = vor.u32 1.1754944e-38, %v280_v22  ;;  %vm279_vm12 = vcmp.eq.f32.partialorder %v278_v23, 8.507059e+37 }
 0x533   :  { %v989_v17 = vpop.eup %988 }
 0x534   :  { %v270_v18 = vmul.f32 %v989_v17, %v268_v16  ;;  %vm275_vm9 = vweird.f32 %v989_v17 }
 0x535   :  { %vm276_vm11 = vmor %vm274_vm10, %vm275_vm9 }
 0x536   :  { %v271_v19 = vsub.f32 1.0, %v270_v18 }
 0x538   :  { %v272_v20 = vmul.f32 %v989_v17, %v271_v19 }
 0x53a   :  { %v273_v21 = vadd.f32 %v989_v17, %v272_v20 }
 0x53c   :  { %v277_v24 = vsel %vm276_vm11, %v989_v17, %v273_v21 }
 0x53d   :  { %v282_v27 = vsel %vm279_vm12, %v281_v25, %v277_v24 }
 0x53e   :  { %v296_v34 = vsub.f32 1.0, %v282_v27  ;;  %v302_v36 = vmul.f32 %v282_v27, %v1198_v5 }
 0x594   :  { %v287_v26 = vpop.permute.xlu1 %286 }
 0x595   :  { %v289_v28 = vmul.f32 %v287_v26, %v282_v27 }
 0x597   :  { %291 = vrot.lane.b32.xlu2 %v289_v28, %s1103_s15 }
 0x5f1   :  { %v292_v29 = vpop.permute.xlu2 %291 }
 0x5f2   :  { %v294_v30 = vadd.f32 %v292_v29, %v263_v12 }
 0x5f4   :  { %990 = vtanh.f32 %v294_v30 }
 0x5fa   :  { %v991_v31 = vpop.eup %990 }
 0x5fb   :  { %298 = vrot.lane.b32.xlu0 %v991_v31, %s1105_s1 }
 0x66d   :  { %v299_v35 = vpop.permute.xlu0 %298 }
 0x66e   :  { %v301_v38 = vmul.f32 %v299_v35, %v296_v34  ;;  %v955_v35 = vld [vmem:[%s1351_s2 + $0x8] sm:$0xff] }
 0x66f   :  { %507 = vmatpush.bf16.msra.mxu1 %v955_v35 }
 0x670   :  { %v1215_v39 = vadd.f32 %v302_v36, %v301_v38  ;;  %v954_v36 = vld [vmem:[%s1351_s2] sm:$0xff] }
 0x672   :  { %v310_v40 = vpack.c.bf16 %v1215_v39, %v1215_v39 }
 0x673   :  { %508 = vmatpush.bf16.msra.mxu1 %v954_v36 }
 0x674   :  { %316 = vrot.lane.b32.xlu1 %v310_v40, %s1105_s1 }
 0x6e6   :  { %v317_v41 = vpop.permute.xlu1 %316 }
 0x6e7   :  { %890 = vmatmul.msk.bf16.vlgmr.msra.gmra.mxu3 %vm49_vm0, %v317_v41 }
 0x76a   :  { %v342_v42 = vpop.f32.mrf.mxu3 }
 0x76b   :  { %v368_v43 = vadd.f32 %v342_v42, %v1169_v6  ;;  %v348_v46 = vadd.f32 %v347_v45, %v342_v42 }
 0x76d   :  { %370 = vrot.lane.b32.xlu2 %v368_v43, %s1103_s15  ;;  %v891_v47 = vmul.f32 -1.442695, %v348_v46 }
 0x76f   :  { %992 = vpow2.f32 %v891_v47 }
 0x772   :  { %v344_v44 = vpop.f32.mrf.mxu3 }
 0x775   :  { %v993_v48 = vpop.eup %992 }
 0x776   :  { %v352_v49 = vadd.f32 1.0, %v993_v48 }
 0x778   :  { %994 = vrcp.f32 %v352_v49  ;;  %v364_v55 = vand.u32 2147483648, %v352_v49  ;;  %vm358_vm14 = vweird.f32 %v352_v49  ;;  %v362_v56 = vand.u32 2147483647, %v352_v49 }
 0x77a   :  { %v365_v58 = vor.u32 1.1754944e-38, %v364_v55  ;;  %vm363_vm1 = vcmp.eq.f32.partialorder %v362_v56, 8.507059e+37 }
 0x77e   :  { %v995_v50 = vpop.eup %994 }
 0x77f   :  { %v354_v51 = vmul.f32 %v995_v50, %v352_v49  ;;  %vm359_vm13 = vweird.f32 %v995_v50  ;;  %v515_v49 = vld [vmem:[#allocation4 + $0x28] sm:$0xff] }
 0x780   :  { %vm360_vm15 = vmor %vm358_vm14, %vm359_vm13 }
 0x781   :  { %v355_v52 = vsub.f32 1.0, %v354_v51 }
 0x783   :  { %v356_v53 = vmul.f32 %v995_v50, %v355_v52 }
 0x785   :  { %v357_v54 = vadd.f32 %v995_v50, %v356_v53 }
 0x787   :  { %v361_v57 = vsel %vm360_vm15, %v995_v50, %v357_v54 }
 0x788   :  { %v366_v60 = vsel %vm363_vm1, %v365_v58, %v361_v57 }
 0x789   :  { %v380_v3 = vsub.f32 1.0, %v366_v60  ;;  %v386_v7 = vmul.f32 %v366_v60, %v1215_v39 }
 0x7c7   :  { %v371_v59 = vpop.permute.xlu2 %370 }
 0x7c8   :  { %v373_v61 = vmul.f32 %v371_v59, %v366_v60 }
 0x7ca   :  { %375 = vrot.lane.b32.xlu0 %v373_v61, %s1103_s15 }
 0x83c   :  { %v376_v62 = vpop.permute.xlu0 %375 }
 0x83d   :  { %v378_v63 = vadd.f32 %v376_v62, %v347_v45 }
 0x83f   :  { %996 = vtanh.f32 %v378_v63 }
 0x845   :  { %v997_v0 = vpop.eup %996 }
 0x846   :  { %382 = vrot.lane.b32.xlu1 %v997_v0, %s1105_s1 }
 0x8b8   :  { %v383_v4 = vpop.permute.xlu1 %382 }
 0x8b9   :  { %v385_v8 = vmul.f32 %v383_v4, %v380_v3 }
 0x8bb   :  { %v1232_v9 = vadd.f32 %v386_v7, %v385_v8  ;;  %v957_v7 = vld [vmem:[%s1351_s2 + $0x8] sm:$0xff]  ;;  %v956_v8 = vld [vmem:[%s1351_s2] sm:$0xff] }
 0x8bc   :  { %591 = vmatpush.bf16.msra.mxu2 %v957_v7 }
 0x8bd   :  { %v394_v10 = vpack.c.bf16 %v1232_v9, %v1232_v9 }
 0x8bf   :  { %400 = vrot.lane.b32.xlu2 %v394_v10, %s1105_s1 }
 0x8c0   :  { %592 = vmatpush.bf16.msra.mxu2 %v956_v8 }
 0x919   :  { %v401_v11 = vpop.permute.xlu2 %400 }
 0x91a   :  { %900 = vmatmul.msk.bf16.vlgmr.msrb.gmra.mxu2 %vm49_vm0, %v401_v11 }
 0x99d   :  { %v426_v12 = vpop.f32.mrf.mxu2 }
 0x99e   :  { %v452_v13 = vadd.f32 %v426_v12, %v1169_v6  ;;  %v432_v16 = vadd.f32 %v431_v15, %v426_v12 }
 0x9a0   :  { %454 = vrot.lane.b32.xlu0 %v452_v13, %s1103_s15  ;;  %v901_v17 = vmul.f32 -1.442695, %v432_v16 }
 0x9a2   :  { %998 = vpow2.f32 %v901_v17 }
 0x9a5   :  { %v428_v14 = vpop.f32.mrf.mxu2 }
 0x9a8   :  { %v999_v18 = vpop.eup %998 }
 0x9a9   :  { %v436_v19 = vadd.f32 1.0, %v999_v18 }
 0x9ab   :  { %1000 = vrcp.f32 %v436_v19  ;;  %v448_v25 = vand.u32 2147483648, %v436_v19  ;;  %vm442_vm3 = vweird.f32 %v436_v19  ;;  %v446_v26 = vand.u32 2147483647, %v436_v19 }
 0x9ad   :  { %v449_v28 = vor.u32 1.1754944e-38, %v448_v25  ;;  %vm447_vm5 = vcmp.eq.f32.partialorder %v446_v26, 8.507059e+37 }
 0x9b1   :  { %v1001_v20 = vpop.eup %1000 }
 0x9b2   :  { %v438_v21 = vmul.f32 %v1001_v20, %v436_v19  ;;  %vm443_vm2 = vweird.f32 %v1001_v20 }
 0x9b3   :  { %vm444_vm4 = vmor %vm442_vm3, %vm443_vm2  ;;  %vm804_vm3 = vcmask 130048  }
 0x9b4   :  { %v439_v22 = vsub.f32 1.0, %v438_v21 }
 0x9b6   :  { %v440_v23 = vmul.f32 %v1001_v20, %v439_v22 }
 0x9b8   :  { %v441_v24 = vadd.f32 %v1001_v20, %v440_v23 }
 0x9ba   :  { %v445_v27 = vsel %vm444_vm4, %v1001_v20, %v441_v24  ;;  %v599_v20 = vld [vmem:[#allocation4 + $0x30] sm:$0xff] }
 0x9bb   :  { %v450_v30 = vsel %vm447_vm5, %v449_v28, %v445_v27 }
 0x9bc   :  { %v464_v38 = vsub.f32 1.0, %v450_v30  ;;  %v470_v41 = vmul.f32 %v450_v30, %v1232_v9 }
 0xa12   :  { %v455_v29 = vpop.permute.xlu0 %454 }
 0xa13   :  { %v457_v31 = vmul.f32 %v455_v29, %v450_v30 }
 0xa15   :  { %459 = vrot.lane.b32.xlu1 %v457_v31, %s1103_s15 }
 0xa87   :  { %v460_v32 = vpop.permute.xlu1 %459 }
 0xa88   :  { %v462_v33 = vadd.f32 %v460_v32, %v431_v15 }
 0xa8a   :  { %1002 = vtanh.f32 %v462_v33 }
 0xa90   :  { %v1003_v34 = vpop.eup %1002 }
 0xa91   :  { %466 = vrot.lane.b32.xlu2 %v1003_v34, %s1105_s1 }
 0xaeb   :  { %v467_v40 = vpop.permute.xlu2 %466 }
 0xaec   :  { %v469_v42 = vmul.f32 %v467_v40, %v464_v38 }
 0xaee   :  { %v1249_v43 = vadd.f32 %v470_v41, %v469_v42  ;;  %v959_v42 = vld [vmem:[%s1351_s2 + $0x8] sm:$0xff] }
 0xaef   :  { %675 = vmatpush.bf16.msrb.mxu3 %v959_v42 }
 0xaf0   :  { %v478_v44 = vpack.c.bf16 %v1249_v43, %v1249_v43 }
 0xaf2   :  { %484 = vrot.lane.b32.xlu0 %v478_v44, %s1105_s1  ;;  %v958_v44 = vld [vmem:[%s1351_s2] sm:$0xff] }
 0xaf3   :  { %676 = vmatpush.bf16.msrb.mxu3 %v958_v44 }
 0xb64   :  { %v485_v45 = vpop.permute.xlu0 %484 }
 0xb65   :  { %910 = vmatmul.msk.bf16.vlgmr.msra.gmra.mxu1 %vm49_vm0, %v485_v45 }
 0xbe2   :  { %v510_v46 = vpop.f32.mrf.mxu1 }
 0xbe3   :  { %v536_v47 = vadd.f32 %v510_v46, %v1169_v6  ;;  %v516_v50 = vadd.f32 %v515_v49, %v510_v46 }
 0xbe5   :  { %538 = vrot.lane.b32.xlu1 %v536_v47, %s1103_s15  ;;  %v911_v51 = vmul.f32 -1.442695, %v516_v50 }
 0xbe7   :  { %1004 = vpow2.f32 %v911_v51 }
 0xbea   :  { %v512_v48 = vpop.f32.mrf.mxu1 }
 0xbed   :  { %v1005_v52 = vpop.eup %1004 }
 0xbee   :  { %v520_v53 = vadd.f32 1.0, %v1005_v52 }
 0xbf0   :  { %1006 = vrcp.f32 %v520_v53  ;;  %v532_v59 = vand.u32 2147483648, %v520_v53  ;;  %vm526_vm7 = vweird.f32 %v520_v53  ;;  %v530_v60 = vand.u32 2147483647, %v520_v53 }
 0xbf2   :  { %v533_v62 = vor.u32 1.1754944e-38, %v532_v59  ;;  %vm531_vm9 = vcmp.eq.f32.partialorder %v530_v60, 8.507059e+37 }
 0xbf6   :  { %v1007_v54 = vpop.eup %1006 }
 0xbf7   :  { %v522_v55 = vmul.f32 %v1007_v54, %v520_v53  ;;  %vm527_vm6 = vweird.f32 %v1007_v54 }
 0xbf8   :  { %vm528_vm8 = vmor %vm526_vm7, %vm527_vm6 }
 0xbf9   :  { %v523_v56 = vsub.f32 1.0, %v522_v55  ;;  %v683_v55 = vld [vmem:[#allocation4 + $0x38] sm:$0xff] }
 0xbfb   :  { %v524_v57 = vmul.f32 %v1007_v54, %v523_v56 }
 0xbfd   :  { %v525_v58 = vadd.f32 %v1007_v54, %v524_v57 }
 0xbff   :  { %v529_v61 = vsel %vm528_vm8, %v1007_v54, %v525_v58 }
 0xc00   :  { %v534_v0 = vsel %vm531_vm9, %v533_v62, %v529_v61 }
 0xc01   :  { %v548_v10 = vsub.f32 1.0, %v534_v0  ;;  %v554_v12 = vmul.f32 %v534_v0, %v1249_v43 }
 0xc57   :  { %v539_v63 = vpop.permute.xlu1 %538 }
 0xc58   :  { %v541_v1 = vmul.f32 %v539_v63, %v534_v0 }
 0xc5a   :  { %543 = vrot.lane.b32.xlu2 %v541_v1, %s1103_s15 }
 0xcb4   :  { %v544_v2 = vpop.permute.xlu2 %543 }
 0xcb5   :  { %v546_v3 = vadd.f32 %v544_v2, %v515_v49 }
 0xcb7   :  { %1008 = vtanh.f32 %v546_v3 }
 0xcbd   :  { %v1009_v4 = vpop.eup %1008 }
 0xcbe   :  { %550 = vrot.lane.b32.xlu0 %v1009_v4, %s1105_s1 }
 0xd30   :  { %v551_v11 = vpop.permute.xlu0 %550 }
 0xd31   :  { %v553_v13 = vmul.f32 %v551_v11, %v548_v10  ;;  %v961_v10 = vld [vmem:[%s1353_s4 + $0x8] sm:$0xff] }
 0xd32   :  { %781 = vmatpush.bf16.msra.mxu0 %v961_v10  ;;  %962 = vmatpush.bf16.msra.mxu3 %v961_v10 }
 0xd33   :  { %v1266_v14 = vadd.f32 %v554_v12, %v553_v13 }
 0xd35   :  { %v562_v15 = vpack.c.bf16 %v1266_v14, %v1266_v14 }
 0xd37   :  { %568 = vrot.lane.b32.xlu1 %v562_v15, %s1105_s1 }
 0xda9   :  { %v569_v16 = vpop.permute.xlu1 %568 }
 0xdaa   :  { %920 = vmatmul.msk.bf16.vlgmr.msra.gmra.mxu2 %vm49_vm0, %v569_v16 }
 0xe2d   :  { %v594_v17 = vpop.f32.mrf.mxu2 }
 0xe2e   :  { %v620_v18 = vadd.f32 %v594_v17, %v1169_v6  ;;  %v600_v21 = vadd.f32 %v599_v20, %v594_v17 }
 0xe30   :  { %622 = vrot.lane.b32.xlu2 %v620_v18, %s1103_s15  ;;  %v921_v22 = vmul.f32 -1.442695, %v600_v21 }
 0xe32   :  { %1010 = vpow2.f32 %v921_v22 }
 0xe35   :  { %v596_v19 = vpop.f32.mrf.mxu2 }
 0xe38   :  { %v1011_v23 = vpop.eup %1010 }
 0xe39   :  { %v604_v24 = vadd.f32 1.0, %v1011_v23 }
 0xe3b   :  { %1012 = vrcp.f32 %v604_v24  ;;  %v616_v30 = vand.u32 2147483648, %v604_v24  ;;  %vm610_vm11 = vweird.f32 %v604_v24  ;;  %v614_v31 = vand.u32 2147483647, %v604_v24 }
 0xe3d   :  { %v617_v33 = vor.u32 1.1754944e-38, %v616_v30  ;;  %vm615_vm13 = vcmp.eq.f32.partialorder %v614_v31, 8.507059e+37  ;;  %v973_v31 = vld [vmem:[%s1354_s5] ss:$0 sm:$0xff]  ;;  %s1106_s5 = smov [#allocation8]  }
 0xe41   :  { %v1013_v25 = vpop.eup %1012 }
 0xe42   :  { %v606_v26 = vmul.f32 %v1013_v25, %v604_v24  ;;  %vm611_vm10 = vweird.f32 %v1013_v25 }
 0xe43   :  { %vm612_vm12 = vmor %vm610_vm11, %vm611_vm10 }
 0xe44   :  { %v607_v27 = vsub.f32 1.0, %v606_v26 }
 0xe46   :  { %v608_v28 = vmul.f32 %v1013_v25, %v607_v27 }
 0xe48   :  { %v609_v29 = vadd.f32 %v1013_v25, %v608_v28 }
 0xe4a   :  { %v613_v32 = vsel %vm612_vm12, %v1013_v25, %v609_v29 }
 0xe4b   :  { %v618_v35 = vsel %vm615_vm13, %v617_v33, %v613_v32 }
 0xe4c   :  { %v632_v45 = vsub.f32 1.0, %v618_v35  ;;  %v638_v47 = vmul.f32 %v618_v35, %v1266_v14 }
 0xe8a   :  { %v623_v34 = vpop.permute.xlu2 %622 }
 0xe8b   :  { %v625_v36 = vmul.f32 %v623_v34, %v618_v35 }
 0xe8d   :  { %627 = vrot.lane.b32.xlu0 %v625_v36, %s1103_s15 }
 0xeff   :  { %v628_v38 = vpop.permute.xlu0 %627 }
 0xf00   :  { %v630_v40 = vadd.f32 %v628_v38, %v599_v20 }
 0xf02   :  { %1014 = vtanh.f32 %v630_v40 }
 0xf08   :  { %v1015_v41 = vpop.eup %1014 }
 0xf09   :  { %634 = vrot.lane.b32.xlu1 %v1015_v41, %s1105_s1 }
 0xf7b   :  { %v635_v46 = vpop.permute.xlu1 %634 }
 0xf7c   :  { %v637_v48 = vmul.f32 %v635_v46, %v632_v45 }
 0xf7e   :  { %v1283_v49 = vadd.f32 %v638_v47, %v637_v48 }
 0xf80   :  { %v646_v50 = vpack.c.bf16 %v1283_v49, %v1283_v49 }
 0xf82   :  { %652 = vrot.lane.b32.xlu2 %v646_v50, %s1105_s1 }
 0xfdc   :  { %v653_v51 = vpop.permute.xlu2 %652 }
 0xfdd   :  { %930 = vmatmul.msk.bf16.vlgmr.msrb.gmra.mxu3 %vm49_vm0, %v653_v51 }
0x1060   :  { %v678_v52 = vpop.f32.mrf.mxu3 }
0x1061   :  { %v704_v53 = vadd.f32 %v678_v52, %v1169_v6  ;;  %v684_v56 = vadd.f32 %v683_v55, %v678_v52 }
0x1063   :  { %706 = vrot.lane.b32.xlu0 %v704_v53, %s1103_s15  ;;  %v931_v57 = vmul.f32 -1.442695, %v684_v56 }
0x1065   :  { %1016 = vpow2.f32 %v931_v57 }
0x1068   :  { %v680_v54 = vpop.f32.mrf.mxu3 }
0x106b   :  { %138 = vrot.lane.b32.xlu0 %v1181_v37, %s1105_s1  ;;  %v1017_v58 = vpop.eup %1016 }
0x106c   :  { %v688_v59 = vadd.f32 1.0, %v1017_v58 }
0x106e   :  { %1018 = vrcp.f32 %v688_v59  ;;  %v700_v37 = vand.u32 2147483648, %v688_v59  ;;  %vm694_vm15 = vweird.f32 %v688_v59  ;;  %v698_v0 = vand.u32 2147483647, %v688_v59 }
0x1070   :  { %v701_v1 = vor.u32 1.1754944e-38, %v700_v37  ;;  %vm699_vm2 = vcmp.eq.f32.partialorder %v698_v0, 8.507059e+37 }
0x1073   :  { %389 = vrot.lane.b32.xlu0 %v1232_v9, %s1105_s1 }
0x1074   :  { %v1019_v6 = vpop.eup %1018 }
0x1075   :  { %v690_v60 = vmul.f32 %v1019_v6, %v688_v59  ;;  %vm695_vm14 = vweird.f32 %v1019_v6 }
0x1076   :  { %vm696_vm1 = vmor %vm694_vm15, %vm695_vm14 }
0x1077   :  { %v691_v61 = vsub.f32 1.0, %v690_v60 }
0x1079   :  { %v692_v62 = vmul.f32 %v1019_v6, %v691_v61 }
0x107b   :  { %473 = vrot.lane.b32.xlu0 %v1249_v43, %s1105_s1  ;;  %v693_v63 = vadd.f32 %v1019_v6, %v692_v62 }
0x107d   :  { %v697_v9 = vsel %vm696_vm1, %v1019_v6, %v693_v63 }
0x107e   :  { %v702_v2 = vsel %vm699_vm2, %v701_v1, %v697_v9 }
0x107f   :  { %v716_v20 = vsub.f32 1.0, %v702_v2  ;;  %v722_v22 = vmul.f32 %v702_v2, %v1283_v49 }
0x10d5   :  { %v707_v43 = vpop.permute.xlu0 %706 }
0x10d6   :  { %v709_v3 = vmul.f32 %v707_v43, %v702_v2 }
0x10d8   :  { %711 = vrot.lane.b32.xlu1 %v709_v3, %s1103_s15 }
0x10dd   :  { %v139_v4 = vpop.permute.xlu0 %138 }
0x10de   :  { %141 = vst.msk [vmem:[#allocation3] sm:$0xff] %vm49_vm0, %v139_v4 }
0x10e0   :  { %221 = vrot.lane.b32.xlu1 %v1198_v5, %s1105_s1  ;;  %v960_v5 = vld [vmem:[%s1353_s4] sm:$0xff] }
0x10e1   :  { %782 = vmatpush.bf16.msra.mxu0 %v960_v5  ;;  %963 = vmatpush.bf16.msra.mxu3 %v960_v5 }
0x10e5   :  { %v390_v7 = vpop.permute.xlu0 %389  ;;  %v731_v16 = vld [vmem:[#allocation3] sm:$0xff] }
0x10e6   :  { %393 = vst.msk [vmem:[#allocation3 + $0x18] sm:$0xff] %vm49_vm0, %v390_v7 }
0x10e8   :  { %641 = vrot.lane.b32.xlu1 %v1283_v49, %s1105_s1 }
0x10ed   :  { %v474_v8 = vpop.permute.xlu0 %473  ;;  %v734_v27 = vld [vmem:[#allocation3 + $0x18] sm:$0xff] }
0x10ee   :  { %477 = vst.msk [vmem:[#allocation3 + $0x20] sm:$0xff] %vm49_vm0, %v474_v8 }
0x10f0   :  { %557 = vrot.lane.b32.xlu1 %v1266_v14, %s1105_s1 }
0x10f5   :  { %v735_v29 = vld [vmem:[#allocation3 + $0x20] sm:$0xff] }
0x114a   :  { %v712_v11 = vpop.permute.xlu1 %711 }
0x114b   :  { %v714_v12 = vadd.f32 %v712_v11, %v683_v55 }
0x114d   :  { %1020 = vtanh.f32 %v714_v12 }
0x1152   :  { %v222_v13 = vpop.permute.xlu1 %221 }
0x1153   :  { %v1021_v15 = vpop.eup %1020  ;;  %225 = vst.msk [vmem:[#allocation3 + $0x8] sm:$0xff] %vm49_vm0, %v222_v13 }
0x1154   :  { %718 = vrot.lane.b32.xlu2 %v1021_v15, %s1105_s1 }
0x115a   :  { %v642_v14 = vpop.permute.xlu1 %641  ;;  %v732_v17 = vld [vmem:[#allocation3 + $0x8] sm:$0xff] }
0x115b   :  { %645 = vst.msk [vmem:[#allocation3 + $0x30] sm:$0xff] %vm49_vm0, %v642_v14  ;;  %v739_v18 = vpack.c.bf16 %v732_v17, %v731_v16 }
0x115c   :  { %305 = vrot.lane.b32.xlu2 %v1215_v39, %s1105_s1 }
0x115d   :  { %940 = vmatmul.msk.bf16.vlgmr.msra.gmra.mxu0 %vm49_vm0, %v739_v18 }
0x1162   :  { %v558_v19 = vpop.permute.xlu1 %557  ;;  %v737_v38 = vld [vmem:[#allocation3 + $0x30] sm:$0xff] }
0x1163   :  { %561 = vst.msk [vmem:[#allocation3 + $0x28] sm:$0xff] %vm49_vm0, %v558_v19 }
0x116a   :  { %v736_v39 = vld [vmem:[#allocation3 + $0x28] sm:$0xff] }
0x116b   :  { %v741_v30 = vpack.c.bf16 %v736_v39, %v735_v29 }
0x11ae   :  { %v719_v21 = vpop.permute.xlu2 %718 }
0x11af   :  { %v721_v23 = vmul.f32 %v719_v21, %v716_v20 }
0x11b1   :  { %v723_v24 = vadd.f32 %v722_v22, %v721_v23 }
0x11b3   :  { %725 = vrot.lane.b32.xlu2 %v723_v24, %s1105_s1  ;;  %s835_s1 = sshll.u32 %s1106_s5, 4  ;;  %s836_s1 = int_to_ptr.vmem [resolvable:$true] %s835_s1 }
0x11b6   :  { %v306_v25 = vpop.permute.xlu2 %305 }
0x11b7   :  { %309 = vst.msk [vmem:[#allocation3 + $0x10] sm:$0xff] %vm49_vm0, %v306_v25 }
0x11be   :  { %v733_v26 = vld [vmem:[#allocation3 + $0x10] sm:$0xff] }
0x11bf   :  { %v740_v28 = vpack.c.bf16 %v734_v27, %v733_v26 }
0x11c1   :  { %941 = vmatmul.msk.bf16.gmra.mxu0 %vm49_vm0, %v740_v28 }
0x11d1   :  { %942 = vmatmul.msk.bf16.gmra.mxu0 %vm49_vm0, %v741_v30 }
0x11da   :  { %v784_v32 = vpop.f32.mrf.mxu0 }
0x11db   :  { %v785_v33 = vadd.f32 %v973_v31, %v784_v32 }
0x11dd   :  { %805 = vst.msk [vmem:[#allocation7] sm:$0xff] %vm804_vm3, %v785_v33 }
0x11e2   :  { %v786_v34 = vpop.f32.mrf.mxu0 }
0x11e3   :  { %v787_v35 = vadd.f32 %v973_v31, %v786_v34 }
0x11e5   :  { %806 = vst.msk [vmem:[#allocation7 + $0x8] sm:$0xff] %vm804_vm3, %v787_v35 }
0x120d   :  { %v726_v36 = vpop.permute.xlu2 %725 }
0x120e   :  { %729 = vst.msk [vmem:[#allocation3 + $0x38] sm:$0xff] %vm49_vm0, %v726_v36 }
0x120f   :  { %730 = vst.msk [vmem:[#allocation2] sm:$0xff] %vm49_vm0, %v726_v36 }
0x1210   :  { %816 = vst.msk [vmem:[#allocation8] sm:$0xff] %vm49_vm0, %v726_v36 }
0x1211   :  { %840 = dma.vmem_to_hbm [thread:$0]  %s836_s1, 128, %s838_s27, [#allocation9]  }
0x1215   :  { %v738_v40 = vld [vmem:[#allocation3 + $0x38] sm:$0xff] }
0x1216   :  { %v742_v41 = vpack.c.bf16 %v738_v40, %v737_v38 }
0x1218   :  { %943 = vmatmul.msk.bf16.vlgmr.msra.gmra.mxu3 %vm49_vm0, %v742_v41 }
0x123e   :  { %v789_v42 = vpop.f32.mrf.mxu0 }
0x123f   :  { %v790_v44 = vadd.f32 %v973_v31, %v789_v42 }
0x1241   :  { %807 = vst.msk [vmem:[#allocation7 + $0x10] sm:$0xff] %vm804_vm3, %v790_v44 }
0x1246   :  { %v791_v45 = vpop.f32.mrf.mxu0 }
0x1247   :  { %v792_v46 = vadd.f32 %v973_v31, %v791_v45 }
0x1249   :  { %808 = vst.msk [vmem:[#allocation7 + $0x18] sm:$0xff] %vm804_vm3, %v792_v46 }
0x124e   :  { %v794_v47 = vpop.f32.mrf.mxu0 }
0x124f   :  { %v795_v48 = vadd.f32 %v973_v31, %v794_v47 }
0x1251   :  { %809 = vst.msk [vmem:[#allocation7 + $0x20] sm:$0xff] %vm804_vm3, %v795_v48 }
0x1256   :  { %v796_v49 = vpop.f32.mrf.mxu0 }
0x1257   :  { %v797_v50 = vadd.f32 %v973_v31, %v796_v49 }
0x1259   :  { %810 = vst.msk [vmem:[#allocation7 + $0x28] sm:$0xff] %vm804_vm3, %v797_v50 }
0x129b   :  { %v799_v51 = vpop.f32.mrf.mxu3 }
0x129c   :  { %v800_v52 = vadd.f32 %v973_v31, %v799_v51 }
0x129e   :  { %811 = vst.msk [vmem:[#allocation7 + $0x30] sm:$0xff] %vm804_vm3, %v800_v52 }
0x12a3   :  { %v801_v53 = vpop.f32.mrf.mxu3 }
0x12a4   :  { %v802_v54 = vadd.f32 %v973_v31, %v801_v53 }
0x12a6   :  { %812 = vst.msk [vmem:[#allocation7 + $0x38] sm:$0xff] %vm804_vm3, %v802_v54 }
0x12a7   :  { %829 = dma.vmem_to_hbm [thread:$0]  %s822_s28, 1024, %s824_s10, [#allocation6], %s1101_s29, %s1101_s29, %s1102_s30  }
0x12a8   :  { %1096 = dma.done.wait [#allocation6], 1024  }
0x12a9   :  { %1097 = vsyncadd [#allocation6], 4294966272 }
0x12aa   :  { %1098 = dma.done.wait [#allocation9], 128  }
0x12ab   :  { %1099 = vsyncadd [#allocation9], 4294967168 }
0x12ac   :  { %849 = vsyncpa [#allocation5], 1 }
0x12ad   :  { %850 = vsyncpa [#allocation6], 1 }
0x12ae   :  { %851 = vsyncpa [#allocation9], 1 }

</bundles_post_ra>
